<compile_context>
chip_gen: v6e
topology: v6e:2x2x1
jax: 0.10.0
libtpu: 0.0.40
codegen_flags: <defaults>
</compile_context>

<pallas_src>
import functools

import jax
import jax.numpy as jnp
from jax import lax
from jax.experimental import pallas as pl
from jax.experimental.pallas import tpu as pltpu


def _pick_tile(n, target=512):
    """Largest multiple of 128 that divides n and is <= target, else n (full)."""
    if n <= target:
        return n
    t = (target // 128) * 128
    while t >= 128:
        if n % t == 0:
            return t
        t -= 128
    return n


# ------------- Kernel A: per-node column stats (p_j and ||x||^2, lane-dense) -------------
def _stats_kernel(x_ref, w_ref, pj_ref, sq_ref):
    x = x_ref[...].astype(jnp.float32)                                  # (tn, C)
    w = w_ref[...].astype(jnp.float32)                                  # (2, C): [w_i; w_j]
    p = lax.dot_general(w, x, (((1,), (1,)), ((), ())),
                        preferred_element_type=jnp.float32)             # (2, tn)
    pj_ref[...] = p[1:2, :]                                             # x . w_j
    ones = jnp.ones((1, x.shape[-1]), jnp.float32)
    # ||x||^2 as a (1, tn) lane-dense row via MXU (no XLU transpose, no VPU reduce).
    sq_ref[...] = lax.dot_general(ones, x * x, (((1,), (1,)), ((), ())),
                                  preferred_element_type=jnp.float32)


def node_stats(xt, w2c, tile):
    B, n, C = xt.shape
    return pl.pallas_call(
        _stats_kernel,
        out_shape=(jax.ShapeDtypeStruct((B, 1, n), jnp.float32),
                   jax.ShapeDtypeStruct((B, 1, n), jnp.float32)),
        grid_spec=pltpu.PrefetchScalarGridSpec(
            num_scalar_prefetch=0,
            grid=(B, n // tile),
            in_specs=[
                pl.BlockSpec((None, tile, C), lambda b, j: (b, j, 0)),
                pl.BlockSpec((2, C), lambda b, j: (0, 0)),
            ],
            out_specs=(
                pl.BlockSpec((None, 1, tile), lambda b, j: (b, 0, j)),
                pl.BlockSpec((None, 1, tile), lambda b, j: (b, 0, j)),
            ),
        ),
        compiler_params=pltpu.CompilerParams(
            dimension_semantics=("parallel", "parallel")),
    )(xt, w2c)


# ------------- Kernel B: fused kNN(k) + EdgeConv(out_ch=1) score -------------
def _knn_score_kernel(xr_ref, xc_ref, sq_ref, pj_ref, w_ref, b_ref,
                      score_ref, topv, topp, *, k):
    j = pl.program_id(2)
    neg = jnp.float32(-jnp.inf)

    @pl.when(j == 0)
    def _():
        # lanes k..127 stay -inf forever (only lanes 0..k-1 are rewritten below)
        topv[...] = jnp.full(topv.shape, neg, jnp.float32)
        topp[...] = jnp.full(topp.shape, neg, jnp.float32)

    xr = xr_ref[...].astype(jnp.float32)          # (tm, C) rows, resident over j
    xc = xc_ref[...].astype(jnp.float32)          # (tn, C) cols, streamed

    # Ranking-only neg distance: -|xi-xj|^2 + |xi|^2 = 2 xi.xj - |xj|^2
    # (row-constant dropped: cannot change per-row top-k).  2x folded into the
    # row operand (power of two -> exact).  bf16 MXU only for larger C; it may
    # flip exact-tie orderings (same trade accepted before, biggest win on v5e).
    if xr.shape[-1] >= 32:
        a, bm = (xr * 2.0).astype(jnp.bfloat16), xc.astype(jnp.bfloat16)
    else:
        a, bm = xr * 2.0, xc
    inner = lax.dot_general(a, bm, (((1,), (1,)), ((), ())),
                            preferred_element_type=jnp.float32)          # (tm, tn)
    d = inner - sq_ref[...]                                              # bcast (1, tn)
    pj_t = jnp.broadcast_to(pj_ref[...], d.shape)                        # (tm, tn)

    # Merge this tile into the running top-k (values + p_j payloads):
    # candidate pool = [carry(128 lanes) ++ tile(tn lanes)], then k rounds of
    # row-max + mask.  No (B,N,N) HBM traffic, no index tracking needed.
    pool_v = jnp.concatenate([topv[...], d], axis=-1)                    # (tm, 128+tn)
    pool_p = jnp.concatenate([topp[...], pj_t], axis=-1)
    for t in range(k):                                                   # static unroll, k=9
        m = jnp.max(pool_v, axis=-1, keepdims=True)                      # (tm, 1)
        hit = pool_v == m
        # TODO(synk): exact duplicate distances are extracted once (all tied
        # slots masked together; payload tie-break = max p_j) vs torch.topk's
        # index-order tie-break; measure-zero for float inputs.
        pay = jnp.max(jnp.where(hit, pool_p, neg), axis=-1, keepdims=True)
        topv[:, t:t + 1] = m
        topp[:, t:t + 1] = pay
        pool_v = jnp.where(hit, neg, pool_v)

    # Epilogue: score_i = tanh(relu(base_i + max_{j in knn(i)} p_j)),
    # base_i = (w_i - w_j).x_i + bias.  (ReLU/max commute: ReLU is monotone.)
    @pl.when(j == pl.num_programs(2) - 1)
    def _():
        w = w_ref[...].astype(jnp.float32)                               # (2, C)
        p_row = lax.dot_general(xr, w, (((1,), (1,)), ((), ())),
                                preferred_element_type=jnp.float32)      # (tm, 2)
        base = p_row[:, 0:1] - p_row[:, 1:2] + b_ref[0]                  # (tm, 1)
        best = jnp.max(topp[...], axis=-1, keepdims=True)                # (tm, 1)
        score_ref[...] = jnp.tanh(jnp.maximum(base + best, 0.0))


def knn_edge_score(xt, sq, pj, w2c, bias, k, tile):
    B, n, C = xt.shape
    tm = tn = tile
    return pl.pallas_call(
        functools.partial(_knn_score_kernel, k=k),
        out_shape=jax.ShapeDtypeStruct((B, n, 1), jnp.float32),
        grid_spec=pltpu.PrefetchScalarGridSpec(
            num_scalar_prefetch=0,
            grid=(B, n // tm, n // tn),
            in_specs=[
                pl.BlockSpec((None, tm, C), lambda b, i, j: (b, i, 0)),  # rows (resident over j)
                pl.BlockSpec((None, tn, C), lambda b, i, j: (b, j, 0)),  # cols (streamed)
                pl.BlockSpec((None, 1, tn), lambda b, i, j: (b, 0, j)),  # ||x_j||^2
                pl.BlockSpec((None, 1, tn), lambda b, i, j: (b, 0, j)),  # p_j
                pl.BlockSpec((2, C), lambda b, i, j: (0, 0)),            # [w_i; w_j]
                pl.BlockSpec(memory_space=pltpu.MemorySpace.SMEM),       # bias scalar
            ],
            out_specs=pl.BlockSpec((None, tm, 1), lambda b, i, j: (b, i, 0)),
            scratch_shapes=[
                pltpu.VMEM((tm, 128), jnp.float32),   # running top-k neg-dists
                pltpu.VMEM((tm, 128), jnp.float32),   # matching p_j payloads
            ],
        ),
        compiler_params=pltpu.CompilerParams(
            dimension_semantics=("parallel", "parallel", "arbitrary")),
    )(xt, xt, sq, pj, w2c, bias)


# ---------------------------------- GraphPooling forward ----------------------------------
def graph_pooling(x_nchw, conv_weight, conv_bias, k=9, ratio=0.5):
    """x_nchw: (B, C, N, 1); returns (B, C, int(N*ratio), 1) like the torch module."""
    B, C, N, _ = x_nchw.shape
    assert k <= 128 and k <= N
    xt = jnp.transpose(x_nchw[..., 0], (0, 2, 1)).astype(jnp.float32)    # (B, N, C)

    w = conv_weight.reshape(2 * C).astype(jnp.float32)
    w2c = jnp.stack([w[:C], w[C:]], axis=0)                              # rows: w_i, w_j
    bias = conv_bias.reshape(1).astype(jnp.float32)

    # Pad N to a multiple of 128 when tiling matters so the distance pass keeps a
    # fixed pipelined tile instead of degenerating to one huge block (VMEM trap).
    if N > 128 and N % 128 != 0:
        n_pad = ((N + 127) // 128) * 128
        xt_p = jnp.pad(xt, ((0, 0), (0, n_pad - N), (0, 0)))
    else:
        n_pad, xt_p = N, xt
    tile = _pick_tile(n_pad)

    # (a) per-node stats: p_j and ||x||^2, lane-dense (B, 1, n_pad).
    pj, sq = node_stats(xt_p, w2c, tile)
    if n_pad != N:
        col = jnp.arange(n_pad, dtype=jnp.int32)[None, None, :]
        sq = jnp.where(col < N, sq, jnp.inf)       # padded cols -> neg-dist = -inf

    # (b) fused kNN + EdgeConv score (no (B,N,N) materialization, no kNN index gather).
    score = knn_edge_score(xt_p, sq, pj, w2c, bias, k, tile)             # (B, n_pad, 1)
    score = score[:, :N, 0]                                              # (B, N)

    # (c) keep top int(N*ratio) nodes by score; gather features channel-last.
    n_keep = int(N * ratio)
    # TODO(synk): small (B, N) -> n_keep selection (sort) left to XLA's top_k.
    _, top_idx = lax.top_k(score, n_keep)                                # (B, n_keep)
    # TODO(synk): data-dependent row gather left to XLA (contiguous C-length rows).
    kept = jnp.take_along_axis(xt, top_idx[:, :, None], axis=1)          # (B, n_keep, C)
    return jnp.transpose(kept, (0, 2, 1))[..., None].astype(x_nchw.dtype)


if __name__ == "__main__":
    key = jax.random.PRNGKey(0)
    kx, kw, kb = jax.random.split(key, 3)

    B, C, N = 2, 8, 32          # x: (B, C, N, 1) point-cloud style input
    K, RATIO = 9, 0.5           # DynConv2d defaults: kernel_size=9, dilation=1

    x = jax.random.normal(kx, (B, C, N, 1), dtype=jnp.float32)
    # Conv2d(2C, 1, kernel_size=1, bias=True): weight (1, 2C, 1, 1), bias (1,)
    conv_weight = (jax.random.normal(kw, (1, 2 * C, 1, 1), jnp.float32)
                   / jnp.sqrt(2.0 * C))
    conv_bias = jax.random.normal(kb, (1,), jnp.float32) * 0.1

    fn = jax.jit(graph_pooling, static_argnums=(3, 4))
    out = jax.block_until_ready(fn(x, conv_weight, conv_bias, K, RATIO))
    assert out.shape == (B, C, int(N * RATIO), 1), out.shape
    assert bool(jnp.all(jnp.isfinite(out)))
    print("KERNEL_OK")
</pallas_src>

<mosaic_0001>
module attributes {stable_mosaic.version = 11 : i64} {
  func.func @_knn_score_kernel(%arg0: i32, %arg1: i32, %arg2: i32, %arg3: memref<1x32x8xf32, #tpu.memory_space<vmem>>, %arg4: memref<1x32x8xf32, #tpu.memory_space<vmem>>, %arg5: memref<1x1x32xf32, #tpu.memory_space<vmem>>, %arg6: memref<1x1x32xf32, #tpu.memory_space<vmem>>, %arg7: memref<2x8xf32, #tpu.memory_space<vmem>>, %arg8: memref<1xf32, #tpu.memory_space<smem>>, %arg9: memref<1x32x1xf32, #tpu.memory_space<vmem>>, %arg10: memref<32x128xf32, #tpu.memory_space<vmem>>, %arg11: memref<32x128xf32, #tpu.memory_space<vmem>>) attributes {dimension_semantics = [#tpu.dimension_semantics<parallel>, #tpu.dimension_semantics<parallel>, #tpu.dimension_semantics<arbitrary>], iteration_bounds = array<i64: 2, 1, 1>, scalar_prefetch = 0 : i64, scratch_operands = 2 : i64, tpu.core_type = #tpu.core_type<tc>, window_params = [{transform_indices = @transform_0, window_bounds = array<i64: 1, 32, 8>}, {transform_indices = @transform_1, window_bounds = array<i64: 1, 32, 8>}, {transform_indices = @transform_2, window_bounds = array<i64: 1, 1, 32>}, {transform_indices = @transform_3, window_bounds = array<i64: 1, 1, 32>}, {pipeline_mode = #tpu.pipeline_mode<synchronous>, transform_indices = @transform_4, window_bounds = array<i64: 2, 8>}, {transform_indices = @transform_5, window_bounds = array<i64: 1>}, {transform_indices = @transform_6, window_bounds = array<i64: 1, 32, 1>}]} {
    %c0_i32 = arith.constant 0 : i32
    %0 = arith.cmpi eq, %arg2, %c0_i32 : i32
    %1 = arith.extui %0 : i1 to i32
    %cst = arith.constant 0xFF800000 : f32
    %c0_i32_0 = arith.constant 0 : i32
    %2 = arith.cmpi ne, %1, %c0_i32_0 : i32
    scf.if %2 {
      %131 = vector.broadcast %cst : f32 to vector<32x128xf32>
      %c0_83 = arith.constant 0 : index
      %c0_84 = arith.constant 0 : index
      %132 = vector.load %arg10[%c0_83, %c0_84] : memref<32x128xf32, #tpu.memory_space<vmem>>, vector<32x128xf32>
      tpu.vector_store %arg10[%c0_83, %c0_84], %131 {strides = array<i32>} : memref<32x128xf32, #tpu.memory_space<vmem>>, vector<32x128xf32>,
      %133 = vector.broadcast %cst : f32 to vector<32x128xf32>
      %c0_85 = arith.constant 0 : index
      %c0_86 = arith.constant 0 : index
      %134 = vector.load %arg11[%c0_85, %c0_86] : memref<32x128xf32, #tpu.memory_space<vmem>>, vector<32x128xf32>
      tpu.vector_store %arg11[%c0_85, %c0_86], %133 {strides = array<i32>} : memref<32x128xf32, #tpu.memory_space<vmem>>, vector<32x128xf32>,
    } else {
    }
    %c0 = arith.constant 0 : index
    %c0_1 = arith.constant 0 : index
    %c0_2 = arith.constant 0 : index
    %3 = vector.load %arg3[%c0, %c0_1, %c0_2] : memref<1x32x8xf32, #tpu.memory_space<vmem>>, vector<1x32x8xf32>
    %4 = vector.shape_cast %3 : vector<1x32x8xf32> to vector<32x8xf32>
    %c0_3 = arith.constant 0 : index
    %c0_4 = arith.constant 0 : index
    %c0_5 = arith.constant 0 : index
    %5 = vector.load %arg4[%c0_3, %c0_4, %c0_5] : memref<1x32x8xf32, #tpu.memory_space<vmem>>, vector<1x32x8xf32>
    %6 = vector.shape_cast %5 : vector<1x32x8xf32> to vector<32x8xf32>
    %cst_6 = arith.constant 2.000000e+00 : f32
    %7 = vector.broadcast %cst_6 : f32 to vector<32x8xf32>
    %8 = arith.mulf %4, %7 : vector<32x8xf32>
    %cst_7 = arith.constant dense<0.000000e+00> : vector<32x32xf32>
    %9 = tpu.matmul %8, %6, %cst_7 {dimension_numbers = #tpu.dot_dimension_numbers<[1], [1], [0], [0], [0, 0, 1, 0], [], []>} : vector<32x8xf32>, vector<32x8xf32>, vector<32x32xf32> -> vector<32x32xf32>
    %c0_8 = arith.constant 0 : index
    %c0_9 = arith.constant 0 : index
    %c0_10 = arith.constant 0 : index
    %10 = vector.load %arg5[%c0_8, %c0_9, %c0_10] : memref<1x1x32xf32, #tpu.memory_space<vmem>>, vector<1x1x32xf32>
    %11 = vector.shape_cast %10 : vector<1x1x32xf32> to vector<1x32xf32>
    %12 = vector.broadcast %11 : vector<1x32xf32> to vector<32x32xf32>
    %13 = arith.subf %9, %12 : vector<32x32xf32>
    %c0_11 = arith.constant 0 : index
    %c0_12 = arith.constant 0 : index
    %c0_13 = arith.constant 0 : index
    %14 = vector.load %arg6[%c0_11, %c0_12, %c0_13] : memref<1x1x32xf32, #tpu.memory_space<vmem>>, vector<1x1x32xf32>
    %15 = vector.shape_cast %14 : vector<1x1x32xf32> to vector<1x32xf32>
    %16 = vector.shape_cast %15 : vector<1x32xf32> to vector<1x32xf32>
    %17 = vector.broadcast %16 : vector<1x32xf32> to vector<32x32xf32>
    %c0_14 = arith.constant 0 : index
    %c0_15 = arith.constant 0 : index
    %18 = vector.load %arg10[%c0_14, %c0_15] : memref<32x128xf32, #tpu.memory_space<vmem>>, vector<32x128xf32>
    %19 = tpu.concatenate %18, %13 in 1 : vector<32x128xf32>, vector<32x32xf32> -> vector<32x160xf32>
    %c0_16 = arith.constant 0 : index
    %c0_17 = arith.constant 0 : index
    %20 = vector.load %arg11[%c0_16, %c0_17] : memref<32x128xf32, #tpu.memory_space<vmem>>, vector<32x128xf32>
    %21 = tpu.concatenate %20, %17 in 1 : vector<32x128xf32>, vector<32x32xf32> -> vector<32x160xf32>
    %cst_18 = arith.constant dense<0xFF800000> : vector<32xf32>
    %22 = vector.multi_reduction <maximumf>, %19, %cst_18 [1] : vector<32x160xf32> to vector<32xf32>
    %23 = vector.shape_cast %22 : vector<32xf32> to vector<32x1xf32>
    %24 = vector.broadcast %23 : vector<32x1xf32> to vector<32x160xf32>
    %25 = arith.cmpf oeq, %19, %24 : vector<32x160xf32>
    %cst_19 = arith.constant 0xFF800000 : f32
    %26 = vector.broadcast %cst_19 : f32 to vector<32x160xf32>
    %27 = arith.select %25, %21, %26 : vector<32x160xi1>, vector<32x160xf32>
    %cst_20 = arith.constant dense<0xFF800000> : vector<32xf32>
    %28 = vector.multi_reduction <maximumf>, %27, %cst_20 [1] : vector<32x160xf32> to vector<32xf32>
    %29 = vector.shape_cast %28 : vector<32xf32> to vector<32x1xf32>
    %c0_21 = arith.constant 0 : index
    %c0_22 = arith.constant 0 : index
    %30 = vector.load %arg10[%c0_21, %c0_22] : memref<32x128xf32, #tpu.memory_space<vmem>>, vector<32x1xf32>
    tpu.vector_store %arg10[%c0_21, %c0_22], %23 {strides = array<i32>} : memref<32x128xf32, #tpu.memory_space<vmem>>, vector<32x1xf32>,
    %c0_23 = arith.constant 0 : index
    %c0_24 = arith.constant 0 : index
    %31 = vector.load %arg11[%c0_23, %c0_24] : memref<32x128xf32, #tpu.memory_space<vmem>>, vector<32x1xf32>
    tpu.vector_store %arg11[%c0_23, %c0_24], %29 {strides = array<i32>} : memref<32x128xf32, #tpu.memory_space<vmem>>, vector<32x1xf32>,
    %cst_25 = arith.constant 0xFF800000 : f32
    %32 = vector.broadcast %cst_25 : f32 to vector<32x160xf32>
    %33 = arith.select %25, %32, %19 : vector<32x160xi1>, vector<32x160xf32>
    %cst_26 = arith.constant dense<0xFF800000> : vector<32xf32>
    %34 = vector.multi_reduction <maximumf>, %33, %cst_26 [1] : vector<32x160xf32> to vector<32xf32>
    %35 = vector.shape_cast %34 : vector<32xf32> to vector<32x1xf32>
    %36 = vector.broadcast %35 : vector<32x1xf32> to vector<32x160xf32>
    %37 = arith.cmpf oeq, %33, %36 : vector<32x160xf32>
    %cst_27 = arith.constant 0xFF800000 : f32
    %38 = vector.broadcast %cst_27 : f32 to vector<32x160xf32>
    %39 = arith.select %37, %21, %38 : vector<32x160xi1>, vector<32x160xf32>
    %cst_28 = arith.constant dense<0xFF800000> : vector<32xf32>
    %40 = vector.multi_reduction <maximumf>, %39, %cst_28 [1] : vector<32x160xf32> to vector<32xf32>
    %41 = vector.shape_cast %40 : vector<32xf32> to vector<32x1xf32>
    %c0_29 = arith.constant 0 : index
    %c1 = arith.constant 1 : index
    %42 = vector.load %arg10[%c0_29, %c1] : memref<32x128xf32, #tpu.memory_space<vmem>>, vector<32x1xf32>
    tpu.vector_store %arg10[%c0_29, %c1], %35 {strides = array<i32>} : memref<32x128xf32, #tpu.memory_space<vmem>>, vector<32x1xf32>,
    %c0_30 = arith.constant 0 : index
    %c1_31 = arith.constant 1 : index
    %43 = vector.load %arg11[%c0_30, %c1_31] : memref<32x128xf32, #tpu.memory_space<vmem>>, vector<32x1xf32>
    tpu.vector_store %arg11[%c0_30, %c1_31], %41 {strides = array<i32>} : memref<32x128xf32, #tpu.memory_space<vmem>>, vector<32x1xf32>,
    %cst_32 = arith.constant 0xFF800000 : f32
    %44 = vector.broadcast %cst_32 : f32 to vector<32x160xf32>
    %45 = arith.select %37, %44, %33 : vector<32x160xi1>, vector<32x160xf32>
    %cst_33 = arith.constant dense<0xFF800000> : vector<32xf32>
    %46 = vector.multi_reduction <maximumf>, %45, %cst_33 [1] : vector<32x160xf32> to vector<32xf32>
    %47 = vector.shape_cast %46 : vector<32xf32> to vector<32x1xf32>
    %48 = vector.broadcast %47 : vector<32x1xf32> to vector<32x160xf32>
    %49 = arith.cmpf oeq, %45, %48 : vector<32x160xf32>
    %cst_34 = arith.constant 0xFF800000 : f32
    %50 = vector.broadcast %cst_34 : f32 to vector<32x160xf32>
    %51 = arith.select %49, %21, %50 : vector<32x160xi1>, vector<32x160xf32>
    %cst_35 = arith.constant dense<0xFF800000> : vector<32xf32>
    %52 = vector.multi_reduction <maximumf>, %51, %cst_35 [1] : vector<32x160xf32> to vector<32xf32>
    %53 = vector.shape_cast %52 : vector<32xf32> to vector<32x1xf32>
    %c0_36 = arith.constant 0 : index
    %c2 = arith.constant 2 : index
    %54 = vector.load %arg10[%c0_36, %c2] : memref<32x128xf32, #tpu.memory_space<vmem>>, vector<32x1xf32>
    tpu.vector_store %arg10[%c0_36, %c2], %47 {strides = array<i32>} : memref<32x128xf32, #tpu.memory_space<vmem>>, vector<32x1xf32>,
    %c0_37 = arith.constant 0 : index
    %c2_38 = arith.constant 2 : index
    %55 = vector.load %arg11[%c0_37, %c2_38] : memref<32x128xf32, #tpu.memory_space<vmem>>, vector<32x1xf32>
    tpu.vector_store %arg11[%c0_37, %c2_38], %53 {strides = array<i32>} : memref<32x128xf32, #tpu.memory_space<vmem>>, vector<32x1xf32>,
    %cst_39 = arith.constant 0xFF800000 : f32
    %56 = vector.broadcast %cst_39 : f32 to vector<32x160xf32>
    %57 = arith.select %49, %56, %45 : vector<32x160xi1>, vector<32x160xf32>
    %cst_40 = arith.constant dense<0xFF800000> : vector<32xf32>
    %58 = vector.multi_reduction <maximumf>, %57, %cst_40 [1] : vector<32x160xf32> to vector<32xf32>
    %59 = vector.shape_cast %58 : vector<32xf32> to vector<32x1xf32>
    %60 = vector.broadcast %59 : vector<32x1xf32> to vector<32x160xf32>
    %61 = arith.cmpf oeq, %57, %60 : vector<32x160xf32>
    %cst_41 = arith.constant 0xFF800000 : f32
    %62 = vector.broadcast %cst_41 : f32 to vector<32x160xf32>
    %63 = arith.select %61, %21, %62 : vector<32x160xi1>, vector<32x160xf32>
    %cst_42 = arith.constant dense<0xFF800000> : vector<32xf32>
    %64 = vector.multi_reduction <maximumf>, %63, %cst_42 [1] : vector<32x160xf32> to vector<32xf32>
    %65 = vector.shape_cast %64 : vector<32xf32> to vector<32x1xf32>
    %c0_43 = arith.constant 0 : index
    %c3 = arith.constant 3 : index
    %66 = vector.load %arg10[%c0_43, %c3] : memref<32x128xf32, #tpu.memory_space<vmem>>, vector<32x1xf32>
    tpu.vector_store %arg10[%c0_43, %c3], %59 {strides = array<i32>} : memref<32x128xf32, #tpu.memory_space<vmem>>, vector<32x1xf32>,
    %c0_44 = arith.constant 0 : index
    %c3_45 = arith.constant 3 : index
    %67 = vector.load %arg11[%c0_44, %c3_45] : memref<32x128xf32, #tpu.memory_space<vmem>>, vector<32x1xf32>
    tpu.vector_store %arg11[%c0_44, %c3_45], %65 {strides = array<i32>} : memref<32x128xf32, #tpu.memory_space<vmem>>, vector<32x1xf32>,
    %cst_46 = arith.constant 0xFF800000 : f32
    %68 = vector.broadcast %cst_46 : f32 to vector<32x160xf32>
    %69 = arith.select %61, %68, %57 : vector<32x160xi1>, vector<32x160xf32>
    %cst_47 = arith.constant dense<0xFF800000> : vector<32xf32>
    %70 = vector.multi_reduction <maximumf>, %69, %cst_47 [1] : vector<32x160xf32> to vector<32xf32>
    %71 = vector.shape_cast %70 : vector<32xf32> to vector<32x1xf32>
    %72 = vector.broadcast %71 : vector<32x1xf32> to vector<32x160xf32>
    %73 = arith.cmpf oeq, %69, %72 : vector<32x160xf32>
    %cst_48 = arith.constant 0xFF800000 : f32
    %74 = vector.broadcast %cst_48 : f32 to vector<32x160xf32>
    %75 = arith.select %73, %21, %74 : vector<32x160xi1>, vector<32x160xf32>
    %cst_49 = arith.constant dense<0xFF800000> : vector<32xf32>
    %76 = vector.multi_reduction <maximumf>, %75, %cst_49 [1] : vector<32x160xf32> to vector<32xf32>
    %77 = vector.shape_cast %76 : vector<32xf32> to vector<32x1xf32>
    %c0_50 = arith.constant 0 : index
    %c4 = arith.constant 4 : index
    %78 = vector.load %arg10[%c0_50, %c4] : memref<32x128xf32, #tpu.memory_space<vmem>>, vector<32x1xf32>
    tpu.vector_store %arg10[%c0_50, %c4], %71 {strides = array<i32>} : memref<32x128xf32, #tpu.memory_space<vmem>>, vector<32x1xf32>,
    %c0_51 = arith.constant 0 : index
    %c4_52 = arith.constant 4 : index
    %79 = vector.load %arg11[%c0_51, %c4_52] : memref<32x128xf32, #tpu.memory_space<vmem>>, vector<32x1xf32>
    tpu.vector_store %arg11[%c0_51, %c4_52], %77 {strides = array<i32>} : memref<32x128xf32, #tpu.memory_space<vmem>>, vector<32x1xf32>,
    %cst_53 = arith.constant 0xFF800000 : f32
    %80 = vector.broadcast %cst_53 : f32 to vector<32x160xf32>
    %81 = arith.select %73, %80, %69 : vector<32x160xi1>, vector<32x160xf32>
    %cst_54 = arith.constant dense<0xFF800000> : vector<32xf32>
    %82 = vector.multi_reduction <maximumf>, %81, %cst_54 [1] : vector<32x160xf32> to vector<32xf32>
    %83 = vector.shape_cast %82 : vector<32xf32> to vector<32x1xf32>
    %84 = vector.broadcast %83 : vector<32x1xf32> to vector<32x160xf32>
    %85 = arith.cmpf oeq, %81, %84 : vector<32x160xf32>
    %cst_55 = arith.constant 0xFF800000 : f32
    %86 = vector.broadcast %cst_55 : f32 to vector<32x160xf32>
    %87 = arith.select %85, %21, %86 : vector<32x160xi1>, vector<32x160xf32>
    %cst_56 = arith.constant dense<0xFF800000> : vector<32xf32>
    %88 = vector.multi_reduction <maximumf>, %87, %cst_56 [1] : vector<32x160xf32> to vector<32xf32>
    %89 = vector.shape_cast %88 : vector<32xf32> to vector<32x1xf32>
    %c0_57 = arith.constant 0 : index
    %c5 = arith.constant 5 : index
    %90 = vector.load %arg10[%c0_57, %c5] : memref<32x128xf32, #tpu.memory_space<vmem>>, vector<32x1xf32>
    tpu.vector_store %arg10[%c0_57, %c5], %83 {strides = array<i32>} : memref<32x128xf32, #tpu.memory_space<vmem>>, vector<32x1xf32>,
    %c0_58 = arith.constant 0 : index
    %c5_59 = arith.constant 5 : index
    %91 = vector.load %arg11[%c0_58, %c5_59] : memref<32x128xf32, #tpu.memory_space<vmem>>, vector<32x1xf32>
    tpu.vector_store %arg11[%c0_58, %c5_59], %89 {strides = array<i32>} : memref<32x128xf32, #tpu.memory_space<vmem>>, vector<32x1xf32>,
    %cst_60 = arith.constant 0xFF800000 : f32
    %92 = vector.broadcast %cst_60 : f32 to vector<32x160xf32>
    %93 = arith.select %85, %92, %81 : vector<32x160xi1>, vector<32x160xf32>
    %cst_61 = arith.constant dense<0xFF800000> : vector<32xf32>
    %94 = vector.multi_reduction <maximumf>, %93, %cst_61 [1] : vector<32x160xf32> to vector<32xf32>
    %95 = vector.shape_cast %94 : vector<32xf32> to vector<32x1xf32>
    %96 = vector.broadcast %95 : vector<32x1xf32> to vector<32x160xf32>
    %97 = arith.cmpf oeq, %93, %96 : vector<32x160xf32>
    %cst_62 = arith.constant 0xFF800000 : f32
    %98 = vector.broadcast %cst_62 : f32 to vector<32x160xf32>
    %99 = arith.select %97, %21, %98 : vector<32x160xi1>, vector<32x160xf32>
    %cst_63 = arith.constant dense<0xFF800000> : vector<32xf32>
    %100 = vector.multi_reduction <maximumf>, %99, %cst_63 [1] : vector<32x160xf32> to vector<32xf32>
    %101 = vector.shape_cast %100 : vector<32xf32> to vector<32x1xf32>
    %c0_64 = arith.constant 0 : index
    %c6 = arith.constant 6 : index
    %102 = vector.load %arg10[%c0_64, %c6] : memref<32x128xf32, #tpu.memory_space<vmem>>, vector<32x1xf32>
    tpu.vector_store %arg10[%c0_64, %c6], %95 {strides = array<i32>} : memref<32x128xf32, #tpu.memory_space<vmem>>, vector<32x1xf32>,
    %c0_65 = arith.constant 0 : index
    %c6_66 = arith.constant 6 : index
    %103 = vector.load %arg11[%c0_65, %c6_66] : memref<32x128xf32, #tpu.memory_space<vmem>>, vector<32x1xf32>
    tpu.vector_store %arg11[%c0_65, %c6_66], %101 {strides = array<i32>} : memref<32x128xf32, #tpu.memory_space<vmem>>, vector<32x1xf32>,
    %cst_67 = arith.constant 0xFF800000 : f32
    %104 = vector.broadcast %cst_67 : f32 to vector<32x160xf32>
    %105 = arith.select %97, %104, %93 : vector<32x160xi1>, vector<32x160xf32>
    %cst_68 = arith.constant dense<0xFF800000> : vector<32xf32>
    %106 = vector.multi_reduction <maximumf>, %105, %cst_68 [1] : vector<32x160xf32> to vector<32xf32>
    %107 = vector.shape_cast %106 : vector<32xf32> to vector<32x1xf32>
    %108 = vector.broadcast %107 : vector<32x1xf32> to vector<32x160xf32>
    %109 = arith.cmpf oeq, %105, %108 : vector<32x160xf32>
    %cst_69 = arith.constant 0xFF800000 : f32
    %110 = vector.broadcast %cst_69 : f32 to vector<32x160xf32>
    %111 = arith.select %109, %21, %110 : vector<32x160xi1>, vector<32x160xf32>
    %cst_70 = arith.constant dense<0xFF800000> : vector<32xf32>
    %112 = vector.multi_reduction <maximumf>, %111, %cst_70 [1] : vector<32x160xf32> to vector<32xf32>
    %113 = vector.shape_cast %112 : vector<32xf32> to vector<32x1xf32>
    %c0_71 = arith.constant 0 : index
    %c7 = arith.constant 7 : index
    %114 = vector.load %arg10[%c0_71, %c7] : memref<32x128xf32, #tpu.memory_space<vmem>>, vector<32x1xf32>
    tpu.vector_store %arg10[%c0_71, %c7], %107 {strides = array<i32>} : memref<32x128xf32, #tpu.memory_space<vmem>>, vector<32x1xf32>,
    %c0_72 = arith.constant 0 : index
    %c7_73 = arith.constant 7 : index
    %115 = vector.load %arg11[%c0_72, %c7_73] : memref<32x128xf32, #tpu.memory_space<vmem>>, vector<32x1xf32>
    tpu.vector_store %arg11[%c0_72, %c7_73], %113 {strides = array<i32>} : memref<32x128xf32, #tpu.memory_space<vmem>>, vector<32x1xf32>,
    %cst_74 = arith.constant 0xFF800000 : f32
    %116 = vector.broadcast %cst_74 : f32 to vector<32x160xf32>
    %117 = arith.select %109, %116, %105 : vector<32x160xi1>, vector<32x160xf32>
    %cst_75 = arith.constant dense<0xFF800000> : vector<32xf32>
    %118 = vector.multi_reduction <maximumf>, %117, %cst_75 [1] : vector<32x160xf32> to vector<32xf32>
    %119 = vector.shape_cast %118 : vector<32xf32> to vector<32x1xf32>
    %120 = vector.broadcast %119 : vector<32x1xf32> to vector<32x160xf32>
    %121 = arith.cmpf oeq, %117, %120 : vector<32x160xf32>
    %cst_76 = arith.constant 0xFF800000 : f32
    %122 = vector.broadcast %cst_76 : f32 to vector<32x160xf32>
    %123 = arith.select %121, %21, %122 : vector<32x160xi1>, vector<32x160xf32>
    %cst_77 = arith.constant dense<0xFF800000> : vector<32xf32>
    %124 = vector.multi_reduction <maximumf>, %123, %cst_77 [1] : vector<32x160xf32> to vector<32xf32>
    %125 = vector.shape_cast %124 : vector<32xf32> to vector<32x1xf32>
    %c0_78 = arith.constant 0 : index
    %c8 = arith.constant 8 : index
    %126 = vector.load %arg10[%c0_78, %c8] : memref<32x128xf32, #tpu.memory_space<vmem>>, vector<32x1xf32>
    tpu.vector_store %arg10[%c0_78, %c8], %119 {strides = array<i32>} : memref<32x128xf32, #tpu.memory_space<vmem>>, vector<32x1xf32>,
    %c0_79 = arith.constant 0 : index
    %c8_80 = arith.constant 8 : index
    %127 = vector.load %arg11[%c0_79, %c8_80] : memref<32x128xf32, #tpu.memory_space<vmem>>, vector<32x1xf32>
    tpu.vector_store %arg11[%c0_79, %c8_80], %125 {strides = array<i32>} : memref<32x128xf32, #tpu.memory_space<vmem>>, vector<32x1xf32>,
    %c0_i32_81 = arith.constant 0 : i32
    %128 = arith.cmpi eq, %arg2, %c0_i32_81 : i32
    %129 = arith.extui %128 : i1 to i32
    %c0_i32_82 = arith.constant 0 : i32
    %130 = arith.cmpi ne, %129, %c0_i32_82 : i32
    scf.if %130 {
      %c0_83 = arith.constant 0 : index
      %c0_84 = arith.constant 0 : index
      %131 = vector.load %arg7[%c0_83, %c0_84] : memref<2x8xf32, #tpu.memory_space<vmem>>, vector<2x8xf32>
      %cst_85 = arith.constant dense<0.000000e+00> : vector<32x2xf32>
      %132 = tpu.matmul %4, %131, %cst_85 {dimension_numbers = #tpu.dot_dimension_numbers<[1], [1], [0], [0], [0, 0, 1, 0], [], []>} : vector<32x8xf32>, vector<2x8xf32>, vector<32x2xf32> -> vector<32x2xf32>
      %133 = vector.extract_strided_slice %132 {offsets = [0, 0], sizes = [32, 1], strides = [1, 1]} : vector<32x2xf32> to vector<32x1xf32>
      %134 = vector.extract_strided_slice %132 {offsets = [0, 1], sizes = [32, 1], strides = [1, 1]} : vector<32x2xf32> to vector<32x1xf32>
      %135 = arith.subf %133, %134 : vector<32x1xf32>
      %c0_86 = arith.constant 0 : index
      %136 = memref.load %arg8[%c0_86] : memref<1xf32, #tpu.memory_space<smem>>
      %137 = vector.broadcast %136 : f32 to vector<32x1xf32>
      %138 = arith.addf %135, %137 : vector<32x1xf32>
      %c0_87 = arith.constant 0 : index
      %c0_88 = arith.constant 0 : index
      %139 = vector.load %arg11[%c0_87, %c0_88] : memref<32x128xf32, #tpu.memory_space<vmem>>, vector<32x128xf32>
      %cst_89 = arith.constant dense<0xFF800000> : vector<32xf32>
      %140 = vector.multi_reduction <maximumf>, %139, %cst_89 [1] : vector<32x128xf32> to vector<32xf32>
      %141 = vector.shape_cast %140 : vector<32xf32> to vector<32x1xf32>
      %142 = arith.addf %138, %141 : vector<32x1xf32>
      %cst_90 = arith.constant 0.000000e+00 : f32
      %143 = vector.broadcast %cst_90 : f32 to vector<32x1xf32>
      %144 = arith.maximumf %142, %143 : vector<32x1xf32>
      %145 = math.tanh %144 : vector<32x1xf32>
      %c0_91 = arith.constant 0 : index
      %c0_92 = arith.constant 0 : index
      %c0_93 = arith.constant 0 : index
      %146 = vector.load %arg9[%c0_91, %c0_92, %c0_93] : memref<1x32x1xf32, #tpu.memory_space<vmem>>, vector<1x32x1xf32>
      %147 = vector.shape_cast %146 : vector<1x32x1xf32> to vector<32x1xf32>
      %148 = vector.shape_cast %145 : vector<32x1xf32> to vector<1x32x1xf32>
      tpu.vector_store %arg9[%c0_91, %c0_92, %c0_93], %148 {strides = array<i32>} : memref<1x32x1xf32, #tpu.memory_space<vmem>>, vector<1x32x1xf32>,
    } else {
    }
    return
  }
  func.func @transform_0(%arg0: i32, %arg1: i32, %arg2: i32) -> (i32, i32, i32) {
    %c0_i32 = arith.constant 0 : i32
    %c0_i32_0 = arith.constant 0 : i32
    return %arg0, %arg1, %c0_i32 : i32, i32, i32
  }
  func.func @transform_1(%arg0: i32, %arg1: i32, %arg2: i32) -> (i32, i32, i32) {
    %c0_i32 = arith.constant 0 : i32
    %c0_i32_0 = arith.constant 0 : i32
    return %arg0, %arg2, %c0_i32 : i32, i32, i32
  }
  func.func @transform_2(%arg0: i32, %arg1: i32, %arg2: i32) -> (i32, i32, i32) {
    %c0_i32 = arith.constant 0 : i32
    %c0_i32_0 = arith.constant 0 : i32
    return %arg0, %c0_i32, %arg2 : i32, i32, i32
  }
  func.func @transform_3(%arg0: i32, %arg1: i32, %arg2: i32) -> (i32, i32, i32) {
    %c0_i32 = arith.constant 0 : i32
    %c0_i32_0 = arith.constant 0 : i32
    return %arg0, %c0_i32, %arg2 : i32, i32, i32
  }
  func.func @transform_4(%arg0: i32, %arg1: i32, %arg2: i32) -> (i32, i32) {
    %c0_i32 = arith.constant 0 : i32
    %c0_i32_0 = arith.constant 0 : i32
    %c0_i32_1 = arith.constant 0 : i32
    return %c0_i32, %c0_i32_0 : i32, i32
  }
  func.func @transform_5(%arg0: i32, %arg1: i32, %arg2: i32) -> i32 {
    %c0_i32 = arith.constant 0 : i32
    %c0_i32_0 = arith.constant 0 : i32
    return %c0_i32 : i32
  }
  func.func @transform_6(%arg0: i32, %arg1: i32, %arg2: i32) -> (i32, i32, i32) {
    %c0_i32 = arith.constant 0 : i32
    %c0_i32_0 = arith.constant 0 : i32
    return %arg0, %arg1, %c0_i32 : i32, i32, i32
  }
}

module attributes {stable_mosaic.version = 11 : i64} {
  func.func @_stats_kernel(%arg0: i32, %arg1: i32, %arg2: memref<1x32x8xf32, #tpu.memory_space<vmem>>, %arg3: memref<2x8xf32, #tpu.memory_space<vmem>>, %arg4: memref<1x1x32xf32, #tpu.memory_space<vmem>>, %arg5: memref<1x1x32xf32, #tpu.memory_space<vmem>>) attributes {dimension_semantics = [#tpu.dimension_semantics<parallel>, #tpu.dimension_semantics<parallel>], iteration_bounds = array<i64: 2, 1>, scalar_prefetch = 0 : i64, scratch_operands = 0 : i64, tpu.core_type = #tpu.core_type<tc>, window_params = [{transform_indices = @transform_0, window_bounds = array<i64: 1, 32, 8>}, {pipeline_mode = #tpu.pipeline_mode<synchronous>, transform_indices = @transform_1, window_bounds = array<i64: 2, 8>}, {transform_indices = @transform_2, window_bounds = array<i64: 1, 1, 32>}, {transform_indices = @transform_3, window_bounds = array<i64: 1, 1, 32>}]} {
    %c0 = arith.constant 0 : index
    %c0_0 = arith.constant 0 : index
    %c0_1 = arith.constant 0 : index
    %0 = vector.load %arg2[%c0, %c0_0, %c0_1] : memref<1x32x8xf32, #tpu.memory_space<vmem>>, vector<1x32x8xf32>
    %1 = vector.shape_cast %0 : vector<1x32x8xf32> to vector<32x8xf32>
    %c0_2 = arith.constant 0 : index
    %c0_3 = arith.constant 0 : index
    %2 = vector.load %arg3[%c0_2, %c0_3] : memref<2x8xf32, #tpu.memory_space<vmem>>, vector<2x8xf32>
    %cst = arith.constant dense<0.000000e+00> : vector<2x32xf32>
    %3 = tpu.matmul %2, %1, %cst {dimension_numbers = #tpu.dot_dimension_numbers<[1], [1], [0], [0], [0, 0, 1, 0], [], []>} : vector<2x8xf32>, vector<32x8xf32>, vector<2x32xf32> -> vector<2x32xf32>
    %4 = vector.extract_strided_slice %3 {offsets = [1, 0], sizes = [1, 32], strides = [1, 1]} : vector<2x32xf32> to vector<1x32xf32>
    %c0_4 = arith.constant 0 : index
    %c0_5 = arith.constant 0 : index
    %c0_6 = arith.constant 0 : index
    %5 = vector.load %arg4[%c0_4, %c0_5, %c0_6] : memref<1x1x32xf32, #tpu.memory_space<vmem>>, vector<1x1x32xf32>
    %6 = vector.shape_cast %5 : vector<1x1x32xf32> to vector<1x32xf32>
    %7 = vector.shape_cast %4 : vector<1x32xf32> to vector<1x1x32xf32>
    tpu.vector_store %arg4[%c0_4, %c0_5, %c0_6], %7 {strides = array<i32>} : memref<1x1x32xf32, #tpu.memory_space<vmem>>, vector<1x1x32xf32>,
    %cst_7 = arith.constant 1.000000e+00 : f32
    %8 = vector.broadcast %cst_7 : f32 to vector<1x8xf32>
    %9 = arith.mulf %1, %1 : vector<32x8xf32>
    %cst_8 = arith.constant dense<0.000000e+00> : vector<1x32xf32>
    %10 = tpu.matmul %8, %9, %cst_8 {dimension_numbers = #tpu.dot_dimension_numbers<[1], [1], [0], [0], [0, 0, 1, 0], [], []>} : vector<1x8xf32>, vector<32x8xf32>, vector<1x32xf32> -> vector<1x32xf32>
    %c0_9 = arith.constant 0 : index
    %c0_10 = arith.constant 0 : index
    %c0_11 = arith.constant 0 : index
    %11 = vector.load %arg5[%c0_9, %c0_10, %c0_11] : memref<1x1x32xf32, #tpu.memory_space<vmem>>, vector<1x1x32xf32>
    %12 = vector.shape_cast %11 : vector<1x1x32xf32> to vector<1x32xf32>
    %13 = vector.shape_cast %10 : vector<1x32xf32> to vector<1x1x32xf32>
    tpu.vector_store %arg5[%c0_9, %c0_10, %c0_11], %13 {strides = array<i32>} : memref<1x1x32xf32, #tpu.memory_space<vmem>>, vector<1x1x32xf32>,
    return
  }
  func.func @transform_0(%arg0: i32, %arg1: i32) -> (i32, i32, i32) {
    %c0_i32 = arith.constant 0 : i32
    %c0_i32_0 = arith.constant 0 : i32
    return %arg0, %arg1, %c0_i32 : i32, i32, i32
  }
  func.func @transform_1(%arg0: i32, %arg1: i32) -> (i32, i32) {
    %c0_i32 = arith.constant 0 : i32
    %c0_i32_0 = arith.constant 0 : i32
    %c0_i32_1 = arith.constant 0 : i32
    return %c0_i32, %c0_i32_0 : i32, i32
  }
  func.func @transform_2(%arg0: i32, %arg1: i32) -> (i32, i32, i32) {
    %c0_i32 = arith.constant 0 : i32
    %c0_i32_0 = arith.constant 0 : i32
    return %arg0, %c0_i32, %arg1 : i32, i32, i32
  }
  func.func @transform_3(%arg0: i32, %arg1: i32) -> (i32, i32, i32) {
    %c0_i32 = arith.constant 0 : i32
    %c0_i32_0 = arith.constant 0 : i32
    return %arg0, %c0_i32, %arg1 : i32, i32, i32
  }
}

</mosaic_0001>

<bundles_post_ra>
// kernel: graph_pooling.2
= control target key start
LH: loop header
LB: loop body
LE: loop exit
PB: predicated region body
PF: predicated region fallthrough
CT: control target
= control target key end

     0   :  { %s636_s12 = smov 0   ;;  %s638_s13 = smov 0   ;;  %s690_s0 = inlined_call_operand.vmem [shape: f32[2,32,8], index: 0, kind: input, shape index: {}]   ;;  %s691_s1 = inlined_call_operand.vmem [shape: f32[2,8], index: 1, kind: input, shape index: {}]   ;;  %s692_s2 = inlined_call_operand.vmem [shape: f32[2,1,32], index: 2, kind: output, shape index: {0}]   ;;  %s693_s3 = inlined_call_operand.vmem [shape: f32[2,1,32], index: 3, kind: output, shape index: {1}]  }
   0x1   :  { %s640_s14 = smov 0  }
   0x2 LB: > { %s26_s15 = sadd.s32 1, %s607_s13  ;;  %p514_p0 = scmp.ge.s32.totalorder %s611_s14, 1  ;;  %s611_s14 = sphi %s640_s14, %s14_s14   ;;  %s607_s13 = sphi %s638_s13, %s695_s13   ;;  %s603_s12 = sphi %s636_s12, %s694_s12  }
   0x3   : > { %p28_p1 = scmp.ge.s32.totalorder %s26_s15, 2  ;;  %p163_p2 = scmp.lt.s32.totalorder %s611_s14, 3 }
   0x5   : > { %s697_s15 = smov (%p28_p1, %s26_s15), 0  ;;  %p164_p3 = pnand %p514_p0, %p163_p2 }
   0x6   : > { %p199_p4 = scmp.lt.s32.totalorder (!%p164_p3), %s603_s12, 1 }
   0x7   : > { %167 = sbr.rel (%p164_p3) target bundleno = 228 (0xe4), region = 28 }
   0xc   : > { %v613_v0 = vmov 0.0   ;;  %s699_s12 = smov (!%p199_p4, %s603_s12), 1  ;;  %vm614_vm0 = vmmov 0   ;;  %vm225_vm1 = vcmask 64512   ;;  %v224_v9 = vld [vmem:[%s691_s1] sm:$0x3] }
   0xd   : > { %540 = vmatprep.subr.mxu0 %v613_v0  ;;  %551 = vmatprep.subr.mxu1 %v613_v0  ;;  %s529_s16 = sshll.u32 %s699_s12, 5  ;;  %v615_v10 = vmov 1.0   ;;  %s213_s24 = scalar_lea.vmem %s692_s2, %s699_s12  ;;  %vm311_vm2 = vcmask 254977   ;;  %vm402_vm3 = vcmask 253952  }
   0xe   : > { %548 = vmatprep.mubr.msk.f32.mxu0 %vm614_vm0, %v613_v0  ;;  %559 = vmatprep.mubr.msk.f32.mxu1 %vm614_vm0, %v613_v0  ;;  %s206_s19 = scalar_lea.vmem %s690_s0, %s529_s16  ;;  %s219_s27 = scalar_lea.vmem %s693_s3, %s699_s12 }
   0xf   : > { %v223_v1 = vld [vmem:[%s206_s19 + $0x18] sm:$0xff]  ;;  %v222_v2 = vld [vmem:[%s206_s19 + $0x10] sm:$0xff]  ;;  %v221_v5 = vld [vmem:[%s206_s19 + $0x8] sm:$0xff] }
  0x10   : > { %541 = vmatpush3.xpose.msk.msra.mxu0 %vm225_vm1, %v223_v1  ;;  %v316_v3 = vmul.f32 %v223_v1, %v223_v1  ;;  %v315_v4 = vmul.f32 %v222_v2, %v222_v2  ;;  %v314_v6 = vmul.f32 %v221_v5, %v221_v5  ;;  %v220_v7 = vld [vmem:[%s206_s19] sm:$0xff] }
  0x11   : > { %542 = vmatprep.subr.mxu0 %v613_v0  ;;  %v313_v8 = vmul.f32 %v220_v7, %v220_v7 }
  0x12   : > { %552 = vmatpush3.xpose.msk.msra.mxu1 %vm225_vm1, %v316_v3 }
  0x13   : > { %553 = vmatprep.subr.mxu1 %v613_v0 }
  0x14   : > { %543 = vmatpush3.xpose.msk.msra.mxu0 %vm225_vm1, %v222_v2 }
  0x15   : > { %544 = vmatprep.subr.mxu0 %v613_v0 }
  0x16   : > { %554 = vmatpush3.xpose.msk.msra.mxu1 %vm225_vm1, %v315_v4 }
  0x17   : > { %555 = vmatprep.subr.mxu1 %v613_v0 }
  0x18   : > { %545 = vmatpush3.xpose.msk.msra.mxu0 %vm225_vm1, %v221_v5 }
  0x19   : > { %546 = vmatprep.subr.mxu0 %v613_v0 }
  0x1a   : > { %556 = vmatpush3.xpose.msk.msra.mxu1 %vm225_vm1, %v314_v6 }
  0x1b   : > { %557 = vmatprep.subr.mxu1 %v613_v0 }
  0x1c   : > { %547 = vmatpush3.xpose.msk.msra.mxu0 %vm225_vm1, %v220_v7 }
  0x1e   : > { %558 = vmatpush3.xpose.msk.msra.mxu1 %vm225_vm1, %v313_v8 }
  0x1f   : > { %549 = vmatmul.mubr.msk.f32.vlgmr.msra.gmra.mxu0 %vm225_vm1, %v224_v9 }
  0x21   : > { %560 = vmatmul.mubr.msk.f32.vlgmr.msra.gmra.mxu1 %vm225_vm1, %v615_v10 }
  0xdf   : > { %v307_v11 = vpop.f32.mrf.mxu0 }
  0xe0   : > { %312 = vst.msk [vmem:[%s213_s24 - $0x1] sm:$0x2] %vm311_vm2, %v307_v11 }
  0xe1   : > { %v550_v12 = vpop.f32.mrf.mxu0  ;;  %v398_v13 = vpop.f32.mrf.mxu1 }
  0xe2   : > { %403 = vst.msk [vmem:[%s219_s27] sm:$0x1] %vm402_vm3, %v398_v13 }
  0xe3   : > { %v561_v14 = vpop.f32.mrf.mxu1 }
  0xe4 PF: > { %s14_s14 = sadd.s32 1, %s611_s14   ;;  %s694_s12 = smov %s607_s13 }
  0xe5   : > { %p11_p5 = scmp.ge.s32.totalorder %s14_s14, 4   ;;  %s695_s13 = smov %s697_s15 }
  0xe7   :  { %13 = sbr.rel (!%p11_p5) target bundleno = 2 (0x2), region = 70 }

// kernel: graph_pooling.3
= control target key start
LH: loop header
LB: loop body
LE: loop exit
PB: predicated region body
PF: predicated region fallthrough
CT: control target
= control target key end

     0   :  { %s1614_s23 = smov 0   ;;  %s1616_s24 = smov 0   ;;  %s1933_s0 = inlined_call_operand.vmem [shape: f32[2,32,8], index: 0, kind: input, shape index: {}, may-alias: {0,1}]   ;;  %s1934_s1 = inlined_call_operand.vmem [shape: f32[2,32,8], index: 1, kind: input, shape index: {}, may-alias: {0,1}]   ;;  %s1935_s2 = inlined_call_operand.vmem [shape: f32[2,1,32], index: 2, kind: input, shape index: {}]   ;;  %s1936_s3 = inlined_call_operand.vmem [shape: f32[2,1,32], index: 3, kind: input, shape index: {}]   ;;  %s1937_s4 = inlined_call_operand.vmem [shape: f32[2,8], index: 4, kind: input, shape index: {}]   ;;  %s1938_s5 = inlined_call_operand.<no memory space> [shape: f32[1], index: 5, kind: input, shape index: {}]   ;;  %s1939_s6 = inlined_call_operand.vmem [shape: f32[2,32,1], index: 6, kind: output, shape index: {}]  }
   0x1   :  { %11 = sst [smem:[#allocation4]] %s1938_s5  ;;  %s1618_s25 = smov 0  }
   0x2 LB: > { %s36_s5 = sadd.s32 1, %s1568_s24  ;;  %p1417_p0 = scmp.ge.s32.totalorder %s1572_s25, 1  ;;  %s1572_s25 = sphi %s1618_s25, %s17_s25   ;;  %s1568_s24 = sphi %s1616_s24, %s1941_s24   ;;  %s1564_s23 = sphi %s1614_s23, %s1940_s23  }
   0x3   : > { %p38_p1 = scmp.ge.s32.totalorder %s36_s5, 2  ;;  %p284_p2 = scmp.lt.s32.totalorder %s1572_s25, 3 }
   0x5   : > { %s1943_s5 = smov (%p38_p1, %s36_s5), 0  ;;  %p285_p3 = pnand %p1417_p0, %p284_p2 }
   0x6   : > { %p344_p4 = scmp.lt.s32.totalorder (!%p285_p3), %s1564_s23, 1  ;;  %s1575_s17 = smov (!%p285_p3), 127  }
   0x7   : > { %288 = sbr.rel (%p285_p3) target bundleno = 1828 (0x724), region = 44  ;;  %s1247_s18 = sld [smem:[#allocation4]] (!%p285_p3) }
   0xc   : > { %s1945_s23 = smov (!%p344_p4, %s1564_s23), 1  ;;  %vm409_vm0 = vcmask 64512   ;;  %v1574_v12 = vmov -inf   ;;  %vm545_vm1 = vcmask 261120   ;;  %vm594_vm2 = vcmask 7168  }
   0xd   : > { %s1635_s26 = sshll.u32 %s1945_s23, 5  ;;  %393 = vst [vmem:[#allocation3] sm:$0xff] %v1574_v12  ;;  %394 = vst [vmem:[#allocation3 + $0x8] sm:$0xff] %v1574_v12  ;;  %s368_s11 = scalar_lea.vmem %s1935_s2, %s1945_s23  ;;  %vm659_vm7 = vcmask 15368   ;;  %vm724_vm12 = vcmask 23568  }
   0xe   : > { %s361_s29 = scalar_lea.vmem %s1934_s1, %s1635_s26  ;;  %s351_s8 = scalar_lea.vmem %s1933_s0, %s1635_s26  ;;  %395 = vst [vmem:[#allocation3 + $0x10] sm:$0xff] %v1574_v12  ;;  %396 = vst [vmem:[#allocation3 + $0x18] sm:$0xff] %v1574_v12  ;;  %v1432_v14 = vld [vmem:[%s368_s11] ss:$0 sm:$0xff] }
   0xf   : > { %v404_v0 = vld [vmem:[%s361_s29 + $0x18] sm:$0xff]  ;;  %v403_v1 = vld [vmem:[%s361_s29 + $0x10] sm:$0xff]  ;;  %v397_v2 = vld [vmem:[%s351_s8] sm:$0xff]  ;;  %s374_s14 = scalar_lea.vmem %s1936_s3, %s1945_s23  ;;  %s383_s21 = scalar_lea.vmem %s1939_s6, %s1635_s26 }
  0x10   : > { %1457 = vmatprep.subr.msk.mxu0 %vm409_vm0, %v404_v0  ;;  %v405_v3 = vmul.f32 2.0, %v397_v2  ;;  %1473 = vmatprep.mubr.msk.f32.mxu1 %vm409_vm0, %v397_v2  ;;  %v402_v4 = vld [vmem:[%s361_s29 + $0x8] sm:$0xff]  ;;  %v401_v5 = vld [vmem:[%s361_s29] sm:$0xff]  ;;  %v1656_v7 = vld [vmem:[%s351_s8 + $0x10] sm:$0xff] }
  0x11   : > { %1458 = vmatpush3.xpose.msk.msra.mxu0 %vm409_vm0, %v404_v0  ;;  %v1653_v6 = vld [vmem:[%s351_s8 + $0x8] sm:$0xff]  ;;  %v407_v9 = vmul.f32 2.0, %v1656_v7  ;;  %v1661_v10 = vld [vmem:[%s351_s8 + $0x18] sm:$0xff]  ;;  %v1679_v26 = vld [vmem:[%s374_s14] ss:$0 sm:$0xff] }
  0x12   : > { %1459 = vmatprep.subr.msk.mxu0 %vm409_vm0, %v403_v1  ;;  %1465 = vmatprep.mubr.msk.f32.mxu0 %vm409_vm0, %v405_v3  ;;  %v406_v8 = vmul.f32 2.0, %v1653_v6  ;;  %v408_v11 = vmul.f32 2.0, %v1661_v10 }
  0x15   : > { %1460 = vmatpush3.xpose.msk.msra.mxu0 %vm409_vm0, %v403_v1 }
  0x16   : > { %1461 = vmatprep.subr.msk.mxu0 %vm409_vm0, %v402_v4 }
  0x19   : > { %1462 = vmatpush3.xpose.msk.msra.mxu0 %vm409_vm0, %v402_v4 }
  0x1a   : > { %1463 = vmatprep.subr.msk.mxu0 %vm409_vm0, %v401_v5 }
  0x1d   : > { %1464 = vmatpush3.xpose.msk.msra.mxu0 %vm409_vm0, %v401_v5 }
  0x20   : > { %1466 = vmatmul.mubr.msk.f32.vlgmr.msra.gmra.mxu0 %vm409_vm0, %v406_v8 }
  0x21   : > { %1468 = vmatprep.mubr.msk.f32.mxu0 %vm409_vm0, %v407_v9 }
  0x24   : > { %1469 = vmatmul.mubr.msk.f32.gmra.mxu0 %vm409_vm0, %v408_v11 }
  0xe0   : > { %v1467_v13 = vpop.f32.mrf.mxu0 }
  0xe1   : > { %v527_v16 = vsub.f32 %v1467_v13, %v1432_v14 }
  0xe2   : > { %v500_v15 = vpop.f32.mrf.mxu0 }
  0xe3   : > { %v526_v17 = vsub.f32 %v500_v15, %v1432_v14  ;;  %v550_v23 = vsel %vm545_vm1, %v527_v16, -inf }
  0xe4   : > { %v1470_v18 = vpop.f32.mrf.mxu0 }
  0xe5   : > { %v546_v19 = vsel %vm545_vm1, %v526_v17, -inf  ;;  %v529_v21 = vsub.f32 %v1470_v18, %v1432_v14 }
  0xe6   : > { %v510_v20 = vpop.f32.mrf.mxu0  ;;  %548 = vmax.xlane.f32.xlu0 %v546_v19 }
  0xe7   : > { %v528_v22 = vsub.f32 %v510_v20, %v1432_v14  ;;  %v558_v25 = vsel %vm545_vm1, %v529_v21, -inf }
  0xe9   : > { %v554_v24 = vsel %vm545_vm1, %v528_v22, -inf }
  0xea   : > { %552 = vmax.xlane.f32.xlu0 %v550_v23  ;;  %556 = vmax.xlane.f32.xlu1 %v554_v24 }
  0xee   : > { %560 = vmax.xlane.f32.xlu1 %v558_v25 }
 0x16f   : > { %v549_v27 = vpop.xlane.xlu0 %548 }
 0x170   : > { %vm563_vm3 = vcmp.eq.f32.partialorder %v526_v17, %v549_v27 }
 0x171   : > { %v604_v28 = vsel %vm563_vm3, -inf, %v526_v17  ;;  %v571_v29 = vsel %vm563_vm3, %v1679_v26, -inf }
 0x172   : > { %v611_v30 = vsel %vm545_vm1, %v604_v28, -inf  ;;  %v1684_v31 = vsel %vm545_vm1, %v571_v29, -inf }
 0x173   : > { %v553_v32 = vpop.xlane.xlu0 %552  ;;  %v557_v33 = vpop.xlane.xlu1 %556  ;;  %613 = vmax.xlane.f32.xlu0 %v611_v30 }
 0x174   : > { %vm565_vm4 = vcmp.eq.f32.partialorder %v527_v16, %v553_v32  ;;  %vm567_vm5 = vcmp.eq.f32.partialorder %v528_v22, %v557_v33 }
 0x175   : > { %v606_v34 = vsel %vm565_vm4, -inf, %v527_v16  ;;  %v608_v35 = vsel %vm567_vm5, -inf, %v528_v22  ;;  %v575_v38 = vsel %vm567_vm5, %v1679_v26, -inf  ;;  %v573_v41 = vsel %vm565_vm4, %v1679_v26, -inf }
 0x176   : > { %v615_v36 = vsel %vm545_vm1, %v606_v34, -inf  ;;  %v619_v37 = vsel %vm545_vm1, %v608_v35, -inf  ;;  %v1690_v40 = vsel %vm545_vm1, %v575_v38, -inf  ;;  %v1694_v43 = vsel %vm545_vm1, %v573_v41, -inf }
 0x177   : > { %v561_v39 = vpop.xlane.xlu1 %560  ;;  %617 = vmax.xlane.f32.xlu1 %v615_v36  ;;  %621 = vmax.xlane.f32.xlu0 %v619_v37  ;;  %vm789_vm4 = vcmask 31768  }
 0x178   : > { %vm569_vm6 = vcmp.eq.f32.partialorder %v529_v21, %v561_v39 }
 0x179   : > { %v610_v42 = vsel %vm569_vm6, -inf, %v529_v21  ;;  %v577_v45 = vsel %vm569_vm6, %v1679_v26, -inf }
 0x17a   : > { %v623_v44 = vsel %vm545_vm1, %v610_v42, -inf  ;;  %v1699_v46 = vsel %vm545_vm1, %v577_v45, -inf }
 0x17b   : > { %625 = vmax.xlane.f32.xlu1 %v623_v44 }
 0x1fc   : > { %v614_v47 = vpop.xlane.xlu0 %613 }
 0x1fd   : > { %vm628_vm8 = vcmp.eq.f32.partialorder %v604_v28, %v614_v47 }
 0x1fe   : > { %v669_v48 = vsel %vm628_vm8, -inf, %v604_v28  ;;  %v636_v49 = vsel %vm628_vm8, %v1679_v26, -inf }
 0x1ff   : > { %v676_v50 = vsel %vm545_vm1, %v669_v48, -inf  ;;  %v1704_v51 = vsel %vm545_vm1, %v636_v49, -inf }
 0x200   : > { %v622_v52 = vpop.xlane.xlu0 %621  ;;  %v618_v53 = vpop.xlane.xlu1 %617  ;;  %678 = vmax.xlane.f32.xlu0 %v676_v50 }
 0x201   : > { %vm632_vm9 = vcmp.eq.f32.partialorder %v608_v35, %v622_v52  ;;  %vm630_vm10 = vcmp.eq.f32.partialorder %v606_v34, %v618_v53 }
 0x202   : > { %v673_v54 = vsel %vm632_vm9, -inf, %v608_v35  ;;  %v671_v55 = vsel %vm630_vm10, -inf, %v606_v34  ;;  %v640_v58 = vsel %vm632_vm9, %v1679_v26, -inf  ;;  %v638_v61 = vsel %vm630_vm10, %v1679_v26, -inf }
 0x203   : > { %v684_v56 = vsel %vm545_vm1, %v673_v54, -inf  ;;  %v680_v57 = vsel %vm545_vm1, %v671_v55, -inf  ;;  %v1710_v60 = vsel %vm545_vm1, %v640_v58, -inf  ;;  %v1714_v63 = vsel %vm545_vm1, %v638_v61, -inf }
 0x204   : > { %v626_v59 = vpop.xlane.xlu1 %625  ;;  %686 = vmax.xlane.f32.xlu0 %v684_v56  ;;  %682 = vmax.xlane.f32.xlu1 %v680_v57  ;;  %vm854_vm10 = vcmask 39968  }
 0x205   : > { %vm634_vm11 = vcmp.eq.f32.partialorder %v610_v42, %v626_v59 }
 0x206   : > { %v675_v62 = vsel %vm634_vm11, -inf, %v610_v42  ;;  %v642_v1 = vsel %vm634_vm11, %v1679_v26, -inf }
 0x207   : > { %v688_v0 = vsel %vm545_vm1, %v675_v62, -inf  ;;  %v1719_v2 = vsel %vm545_vm1, %v642_v1, -inf }
 0x208   : > { %690 = vmax.xlane.f32.xlu1 %v688_v0 }
 0x289   : > { %v679_v3 = vpop.xlane.xlu0 %678 }
 0x28a   : > { %vm693_vm13 = vcmp.eq.f32.partialorder %v669_v48, %v679_v3 }
 0x28b   : > { %v734_v4 = vsel %vm693_vm13, -inf, %v669_v48  ;;  %v701_v5 = vsel %vm693_vm13, %v1679_v26, -inf }
 0x28c   : > { %v741_v8 = vsel %vm545_vm1, %v734_v4, -inf  ;;  %v1724_v9 = vsel %vm545_vm1, %v701_v5, -inf }
 0x28d   : > { %v687_v11 = vpop.xlane.xlu0 %686  ;;  %v683_v12 = vpop.xlane.xlu1 %682  ;;  %743 = vmax.xlane.f32.xlu0 %v741_v8 }
 0x28e   : > { %vm697_vm14 = vcmp.eq.f32.partialorder %v673_v54, %v687_v11  ;;  %vm695_vm15 = vcmp.eq.f32.partialorder %v671_v55, %v683_v12 }
 0x28f   : > { %v738_v13 = vsel %vm697_vm14, -inf, %v673_v54  ;;  %v736_v14 = vsel %vm695_vm15, -inf, %v671_v55  ;;  %v705_v17 = vsel %vm697_vm14, %v1679_v26, -inf  ;;  %v703_v20 = vsel %vm695_vm15, %v1679_v26, -inf }
 0x290   : > { %v749_v15 = vsel %vm545_vm1, %v738_v13, -inf  ;;  %v745_v16 = vsel %vm545_vm1, %v736_v14, -inf  ;;  %v1730_v19 = vsel %vm545_vm1, %v705_v17, -inf  ;;  %v1734_v22 = vsel %vm545_vm1, %v703_v20, -inf }
 0x291   : > { %v691_v18 = vpop.xlane.xlu1 %690  ;;  %751 = vmax.xlane.f32.xlu0 %v749_v15  ;;  %747 = vmax.xlane.f32.xlu1 %v745_v16 }
 0x292   : > { %vm699_vm3 = vcmp.eq.f32.partialorder %v675_v62, %v691_v18 }
 0x293   : > { %v740_v21 = vsel %vm699_vm3, -inf, %v675_v62  ;;  %v707_v24 = vsel %vm699_vm3, %v1679_v26, -inf  ;;  %vm919_vm3 = vcmask 48168  }
 0x294   : > { %v753_v23 = vsel %vm545_vm1, %v740_v21, -inf  ;;  %v1739_v25 = vsel %vm545_vm1, %v707_v24, -inf }
 0x295   : > { %755 = vmax.xlane.f32.xlu1 %v753_v23 }
 0x316   : > { %v744_v27 = vpop.xlane.xlu0 %743 }
 0x317   : > { %vm758_vm5 = vcmp.eq.f32.partialorder %v734_v4, %v744_v27 }
 0x318   : > { %v799_v28 = vsel %vm758_vm5, -inf, %v734_v4  ;;  %v766_v29 = vsel %vm758_vm5, %v1679_v26, -inf }
 0x319   : > { %v806_v30 = vsel %vm545_vm1, %v799_v28, -inf  ;;  %v1744_v32 = vsel %vm545_vm1, %v766_v29, -inf }
 0x31a   : > { %v752_v33 = vpop.xlane.xlu0 %751  ;;  %v748_v34 = vpop.xlane.xlu1 %747  ;;  %808 = vmax.xlane.f32.xlu0 %v806_v30 }
 0x31b   : > { %vm762_vm6 = vcmp.eq.f32.partialorder %v738_v13, %v752_v33  ;;  %vm760_vm8 = vcmp.eq.f32.partialorder %v736_v14, %v748_v34 }
 0x31c   : > { %v803_v35 = vsel %vm762_vm6, -inf, %v738_v13  ;;  %v801_v36 = vsel %vm760_vm8, -inf, %v736_v14  ;;  %v770_v39 = vsel %vm762_vm6, %v1679_v26, -inf  ;;  %v768_v44 = vsel %vm760_vm8, %v1679_v26, -inf }
 0x31d   : > { %v814_v37 = vsel %vm545_vm1, %v803_v35, -inf  ;;  %v810_v38 = vsel %vm545_vm1, %v801_v36, -inf  ;;  %v1750_v42 = vsel %vm545_vm1, %v770_v39, -inf  ;;  %v1754_v47 = vsel %vm545_vm1, %v768_v44, -inf }
 0x31e   : > { %v756_v41 = vpop.xlane.xlu1 %755  ;;  %816 = vmax.xlane.f32.xlu0 %v814_v37  ;;  %812 = vmax.xlane.f32.xlu1 %v810_v38 }
 0x31f   : > { %vm764_vm9 = vcmp.eq.f32.partialorder %v740_v21, %v756_v41 }
 0x320   : > { %v805_v45 = vsel %vm764_vm9, -inf, %v740_v21  ;;  %v772_v49 = vsel %vm764_vm9, %v1679_v26, -inf }
 0x321   : > { %v818_v48 = vsel %vm545_vm1, %v805_v45, -inf  ;;  %v1759_v50 = vsel %vm545_vm1, %v772_v49, -inf }
 0x322   : > { %820 = vmax.xlane.f32.xlu1 %v818_v48 }
 0x3a3   : > { %v809_v52 = vpop.xlane.xlu0 %808 }
 0x3a4   : > { %vm823_vm11 = vcmp.eq.f32.partialorder %v799_v28, %v809_v52 }
 0x3a5   : > { %v864_v53 = vsel %vm823_vm11, -inf, %v799_v28  ;;  %v831_v54 = vsel %vm823_vm11, %v1679_v26, -inf  ;;  %vm984_vm11 = vcmask 56368  }
 0x3a6   : > { %v871_v55 = vsel %vm545_vm1, %v864_v53, -inf  ;;  %v1764_v56 = vsel %vm545_vm1, %v831_v54, -inf }
 0x3a7   : > { %v817_v57 = vpop.xlane.xlu0 %816  ;;  %v813_v58 = vpop.xlane.xlu1 %812  ;;  %873 = vmax.xlane.f32.xlu0 %v871_v55 }
 0x3a8   : > { %vm827_vm13 = vcmp.eq.f32.partialorder %v803_v35, %v817_v57  ;;  %vm825_vm14 = vcmp.eq.f32.partialorder %v801_v36, %v813_v58 }
 0x3a9   : > { %v868_v59 = vsel %vm827_vm13, -inf, %v803_v35  ;;  %v866_v61 = vsel %vm825_vm14, -inf, %v801_v36  ;;  %v835_v1 = vsel %vm827_vm13, %v1679_v26, -inf  ;;  %v833_v5 = vsel %vm825_vm14, %v1679_v26, -inf }
 0x3aa   : > { %v879_v62 = vsel %vm545_vm1, %v868_v59, -inf  ;;  %v875_v0 = vsel %vm545_vm1, %v866_v61, -inf  ;;  %v1770_v4 = vsel %vm545_vm1, %v835_v1, -inf  ;;  %v1774_v11 = vsel %vm545_vm1, %v833_v5, -inf }
 0x3ab   : > { %v821_v3 = vpop.xlane.xlu1 %820  ;;  %881 = vmax.xlane.f32.xlu0 %v879_v62  ;;  %877 = vmax.xlane.f32.xlu1 %v875_v0 }
 0x3ac   : > { %vm829_vm15 = vcmp.eq.f32.partialorder %v805_v45, %v821_v3 }
 0x3ad   : > { %v870_v8 = vsel %vm829_vm15, -inf, %v805_v45  ;;  %v837_v13 = vsel %vm829_vm15, %v1679_v26, -inf }
 0x3ae   : > { %v883_v12 = vsel %vm545_vm1, %v870_v8, -inf  ;;  %v1779_v14 = vsel %vm545_vm1, %v837_v13, -inf }
 0x3af   : > { %885 = vmax.xlane.f32.xlu1 %v883_v12 }
 0x430   : > { %v874_v15 = vpop.xlane.xlu0 %873 }
 0x431   : > { %vm888_vm5 = vcmp.eq.f32.partialorder %v864_v53, %v874_v15  ;;  %v1126_v15 = vld [vmem:[%s1937_s4] sm:$0x3] }
 0x432   : > { %v929_v16 = vsel %vm888_vm5, -inf, %v864_v53  ;;  %v896_v17 = vsel %vm888_vm5, %v1679_v26, -inf  ;;  %1471 = vmatprep.subr.msk.mxu1 %vm409_vm0, %v1126_v15 }
 0x433   : > { %v936_v18 = vsel %vm545_vm1, %v929_v16, -inf  ;;  %v1784_v20 = vsel %vm545_vm1, %v896_v17, -inf  ;;  %1472 = vmatpush3.xpose.msk.msra.mxu1 %vm409_vm0, %v1126_v15 }
 0x434   : > { %v882_v21 = vpop.xlane.xlu0 %881  ;;  %v878_v23 = vpop.xlane.xlu1 %877  ;;  %938 = vmax.xlane.f32.xlu0 %v936_v18 }
 0x435   : > { %vm892_vm6 = vcmp.eq.f32.partialorder %v868_v59, %v882_v21  ;;  %vm890_vm8 = vcmp.eq.f32.partialorder %v866_v61, %v878_v23 }
 0x436   : > { %v933_v24 = vsel %vm892_vm6, -inf, %v868_v59  ;;  %v931_v27 = vsel %vm890_vm8, -inf, %v866_v61  ;;  %v900_v30 = vsel %vm892_vm6, %v1679_v26, -inf  ;;  %v898_v35 = vsel %vm890_vm8, %v1679_v26, -inf  ;;  %1474 = vmatmul.mubr.msk.f32.vlgmr.msra.gmra.mxu1 %vm409_vm0, %v1653_v6 }
 0x437   : > { %v944_v28 = vsel %vm545_vm1, %v933_v24, -inf  ;;  %v940_v29 = vsel %vm545_vm1, %v931_v27, -inf  ;;  %v1790_v34 = vsel %vm545_vm1, %v900_v30, -inf  ;;  %v1794_v37 = vsel %vm545_vm1, %v898_v35, -inf  ;;  %1476 = vmatprep.mubr.msk.f32.mxu1 %vm409_vm0, %v1656_v7 }
 0x438   : > { %v886_v33 = vpop.xlane.xlu1 %885  ;;  %946 = vmax.xlane.f32.xlu0 %v944_v28  ;;  %942 = vmax.xlane.f32.xlu1 %v940_v29  ;;  %vm1049_vm6 = vcmask 64568  }
 0x439   : > { %vm894_vm9 = vcmp.eq.f32.partialorder %v870_v8, %v886_v33 }
 0x43a   : > { %v935_v36 = vsel %vm894_vm9, -inf, %v870_v8  ;;  %v902_v39 = vsel %vm894_vm9, %v1679_v26, -inf  ;;  %1477 = vmatmul.mubr.msk.f32.gmra.mxu1 %vm409_vm0, %v1661_v10 }
 0x43b   : > { %v948_v38 = vsel %vm545_vm1, %v935_v36, -inf  ;;  %v1799_v41 = vsel %vm545_vm1, %v902_v39, -inf }
 0x43c   : > { %950 = vmax.xlane.f32.xlu1 %v948_v38 }
 0x4bd   : > { %v939_v44 = vpop.xlane.xlu0 %938 }
 0x4be   : > { %vm953_vm13 = vcmp.eq.f32.partialorder %v929_v16, %v939_v44 }
 0x4bf   : > { %v994_v45 = vsel %vm953_vm13, -inf, %v929_v16  ;;  %v961_v48 = vsel %vm953_vm13, %v1679_v26, -inf }
 0x4c0   : > { %v1001_v49 = vsel %vm545_vm1, %v994_v45, -inf  ;;  %v1804_v52 = vsel %vm545_vm1, %v961_v48, -inf }
 0x4c1   : > { %v947_v53 = vpop.xlane.xlu0 %946  ;;  %v943_v54 = vpop.xlane.xlu1 %942  ;;  %1003 = vmax.xlane.f32.xlu0 %v1001_v49 }
 0x4c2   : > { %vm957_vm14 = vcmp.eq.f32.partialorder %v933_v24, %v947_v53  ;;  %vm955_vm15 = vcmp.eq.f32.partialorder %v931_v27, %v943_v54 }
 0x4c3   : > { %v998_v55 = vsel %vm957_vm14, -inf, %v933_v24  ;;  %v996_v57 = vsel %vm955_vm15, -inf, %v931_v27  ;;  %v965_v61 = vsel %vm957_vm14, %v1679_v26, -inf  ;;  %v963_v1 = vsel %vm955_vm15, %v1679_v26, -inf }
 0x4c4   : > { %v1009_v58 = vsel %vm545_vm1, %v998_v55, -inf  ;;  %v1005_v59 = vsel %vm545_vm1, %v996_v57, -inf  ;;  %v1810_v0 = vsel %vm545_vm1, %v965_v61, -inf  ;;  %v1814_v5 = vsel %vm545_vm1, %v963_v1, -inf }
 0x4c5   : > { %v951_v62 = vpop.xlane.xlu1 %950  ;;  %1011 = vmax.xlane.f32.xlu0 %v1009_v58  ;;  %1007 = vmax.xlane.f32.xlu1 %v1005_v59  ;;  %vm1114_vm14 = vcmask 72768  }
 0x4c6   : > { %vm959_vm5 = vcmp.eq.f32.partialorder %v935_v36, %v951_v62 }
 0x4c7   : > { %v1000_v3 = vsel %vm959_vm5, -inf, %v935_v36  ;;  %v967_v12 = vsel %vm959_vm5, %v1679_v26, -inf }
 0x4c8   : > { %v1013_v8 = vsel %vm545_vm1, %v1000_v3, -inf  ;;  %v1819_v13 = vsel %vm545_vm1, %v967_v12, -inf }
 0x4c9   : > { %1015 = vmax.xlane.f32.xlu1 %v1013_v8 }
 0x54a   : > { %v1004_v16 = vpop.xlane.xlu0 %1003 }
 0x54b   : > { %vm1018_vm8 = vcmp.eq.f32.partialorder %v994_v45, %v1004_v16 }
 0x54c   : > { %v1059_v17 = vsel %vm1018_vm8, -inf, %v994_v45  ;;  %v1026_v18 = vsel %vm1018_vm8, %v1679_v26, -inf }
 0x54d   : > { %v1066_v21 = vsel %vm545_vm1, %v1059_v17, -inf  ;;  %v1033_v23 = vsel %vm545_vm1, %v1026_v18, -inf }
 0x54e   : > { %v1012_v24 = vpop.xlane.xlu0 %1011  ;;  %v1008_v27 = vpop.xlane.xlu1 %1007  ;;  %1068 = vmax.xlane.f32.xlu0 %v1066_v21 }
 0x54f   : > { %vm1022_vm9 = vcmp.eq.f32.partialorder %v998_v55, %v1012_v24  ;;  %vm1020_vm13 = vcmp.eq.f32.partialorder %v996_v57, %v1008_v27 }
 0x550   : > { %v1063_v6 = vsel %vm1022_vm9, -inf, %v998_v55  ;;  %v1061_v7 = vsel %vm1020_vm13, -inf, %v996_v57  ;;  %v1030_v29 = vsel %vm1022_vm9, %v1679_v26, -inf  ;;  %v1028_v35 = vsel %vm1020_vm13, %v1679_v26, -inf }
 0x551   : > { %v1074_v28 = vsel %vm545_vm1, %v1063_v6, -inf  ;;  %v1070_v10 = vsel %vm545_vm1, %v1061_v7, -inf  ;;  %v1041_v33 = vsel %vm545_vm1, %v1030_v29, -inf  ;;  %v1037_v38 = vsel %vm545_vm1, %v1028_v35, -inf  ;;  %v1475_v29 = vpop.f32.mrf.mxu1 }
 0x552   : > { %v1016_v30 = vpop.xlane.xlu1 %1015  ;;  %1076 = vmax.xlane.f32.xlu0 %v1074_v28  ;;  %1072 = vmax.xlane.f32.xlu1 %v1070_v10 }
 0x553   : > { %vm1024_vm0 = vcmp.eq.f32.partialorder %v1000_v3, %v1016_v30  ;;  %v1208_v30 = vpop.f32.mrf.mxu1 }
 0x554   : > { %v1065_v36 = vsel %vm1024_vm0, -inf, %v1000_v3  ;;  %v1032_v44 = vsel %vm1024_vm0, %v1679_v26, -inf }
 0x555   : > { %v1078_v39 = vsel %vm545_vm1, %v1065_v36, -inf  ;;  %v1045_v45 = vsel %vm545_vm1, %v1032_v44, -inf  ;;  %v1248_v44 = vstv %s1247_s18 }
 0x556   : > { %580 = vmax.xlane.f32.xlu0 %v1684_v31  ;;  %1080 = vmax.xlane.f32.xlu1 %v1078_v39 }
 0x55a   : > { %588 = vmax.xlane.f32.xlu0 %v1690_v40  ;;  %584 = vmax.xlane.f32.xlu1 %v1694_v43 }
 0x55e   : > { %645 = vmax.xlane.f32.xlu0 %v1704_v51  ;;  %592 = vmax.xlane.f32.xlu1 %v1699_v46 }
 0x562   : > { %653 = vmax.xlane.f32.xlu0 %v1710_v60  ;;  %649 = vmax.xlane.f32.xlu1 %v1714_v63 }
 0x566   : > { %710 = vmax.xlane.f32.xlu0 %v1724_v9  ;;  %657 = vmax.xlane.f32.xlu1 %v1719_v2 }
 0x56a   : > { %718 = vmax.xlane.f32.xlu0 %v1730_v19  ;;  %714 = vmax.xlane.f32.xlu1 %v1734_v22 }
 0x56e   : > { %775 = vmax.xlane.f32.xlu0 %v1744_v32  ;;  %722 = vmax.xlane.f32.xlu1 %v1739_v25  ;;  %v1513_v25 = vld [vmem:[#allocation3 + $0x8] sm:$0xff] }
 0x572   : > { %783 = vmax.xlane.f32.xlu0 %v1750_v42  ;;  %779 = vmax.xlane.f32.xlu1 %v1754_v47 }
 0x576   : > { %840 = vmax.xlane.f32.xlu0 %v1764_v56  ;;  %787 = vmax.xlane.f32.xlu1 %v1759_v50 }
 0x57a   : > { %848 = vmax.xlane.f32.xlu0 %v1770_v4  ;;  %844 = vmax.xlane.f32.xlu1 %v1774_v11 }
 0x57e   : > { %905 = vmax.xlane.f32.xlu0 %v1784_v20  ;;  %852 = vmax.xlane.f32.xlu1 %v1779_v14 }
 0x582   : > { %913 = vmax.xlane.f32.xlu0 %v1790_v34  ;;  %909 = vmax.xlane.f32.xlu1 %v1794_v37 }
 0x586   : > { %970 = vmax.xlane.f32.xlu0 %v1804_v52  ;;  %917 = vmax.xlane.f32.xlu1 %v1799_v41 }
 0x58a   : > { %978 = vmax.xlane.f32.xlu0 %v1810_v0  ;;  %974 = vmax.xlane.f32.xlu1 %v1814_v5 }
 0x58e   : > { %1035 = vmax.xlane.f32.xlu0 %v1033_v23  ;;  %982 = vmax.xlane.f32.xlu1 %v1819_v13 }
 0x592   : > { %1043 = vmax.xlane.f32.xlu0 %v1041_v33  ;;  %1039 = vmax.xlane.f32.xlu1 %v1037_v38  ;;  %v1478_v33 = vpop.f32.mrf.mxu1 }
 0x594   : > { %v1218_v35 = vpop.f32.mrf.mxu1 }
 0x596   : > { %1047 = vmax.xlane.f32.xlu1 %v1045_v45 }
 0x5d7   : > { %v1069_v31 = vpop.xlane.xlu0 %1068 }
 0x5d8   : > { %vm1083_vm15 = vcmp.eq.f32.partialorder %v1059_v17, %v1069_v31 }
 0x5d9   : > { %v1091_v40 = vsel %vm1083_vm15, %v1679_v26, -inf }
 0x5da   : > { %v1098_v43 = vsel %vm545_vm1, %v1091_v40, -inf }
 0x5db   : > { %v1077_v46 = vpop.xlane.xlu0 %1076  ;;  %v1073_v51 = vpop.xlane.xlu1 %1072  ;;  %1100 = vmax.xlane.f32.xlu0 %v1098_v43 }
 0x5dc   : > { %vm1087_vm5 = vcmp.eq.f32.partialorder %v1063_v6, %v1077_v46  ;;  %vm1085_vm8 = vcmp.eq.f32.partialorder %v1061_v7, %v1073_v51 }
 0x5dd   : > { %v1095_v60 = vsel %vm1087_vm5, %v1679_v26, -inf  ;;  %v1093_v63 = vsel %vm1085_vm8, %v1679_v26, -inf }
 0x5de   : > { %v1106_v2 = vsel %vm545_vm1, %v1095_v60, -inf  ;;  %v1102_v9 = vsel %vm545_vm1, %v1093_v63, -inf }
 0x5df   : > { %v581_v19 = vpop.xlane.xlu0 %580  ;;  %v1081_v22 = vpop.xlane.xlu1 %1080  ;;  %1108 = vmax.xlane.f32.xlu0 %v1106_v2  ;;  %1104 = vmax.xlane.f32.xlu1 %v1102_v9 }
 0x5e0   : > { %599 = vst.msk [vmem:[#allocation3] sm:$0xff] %vm594_vm2, %v581_v19  ;;  %vm1089_vm9 = vcmp.eq.f32.partialorder %v1065_v36, %v1081_v22  ;;  %vm1549_vm13 = vcmp.eq.f32.partialorder %v1081_v22, -inf }
 0x5e1   : > { %v1096_v32 = vsel %vm1549_vm13, %v1513_v25, -inf  ;;  %v1097_v42 = vsel %vm1089_vm9, %v1679_v26, -inf }
 0x5e2   : > { %v1110_v47 = vsel %vm545_vm1, %v1097_v42, -inf }
 0x5e3   : > { %v589_v50 = vpop.xlane.xlu0 %588  ;;  %v585_v56 = vpop.xlane.xlu1 %584  ;;  %v1111_v4 = vmax.f32 %v1096_v32, %v1110_v47 }
 0x5e4   : > { %601 = vst.msk [vmem:[#allocation3 + $0x10] sm:$0xff] %vm594_vm2, %v589_v50  ;;  %600 = vst.msk [vmem:[#allocation3 + $0x8] sm:$0xff] %vm594_vm2, %v585_v56 }
 0x5e5   : > { %1112 = vmax.xlane.f32.xlu1 %v1111_v4 }
 0x5e7   : > { %v646_v11 = vpop.xlane.xlu0 %645  ;;  %v593_v14 = vpop.xlane.xlu1 %592 }
 0x5e8   : > { %664 = vst.msk [vmem:[#allocation3] sm:$0xff] %vm659_vm7, %v646_v11 }
 0x5e9   : > { %602 = vst.msk [vmem:[#allocation3 + $0x18] sm:$0xff] %vm594_vm2, %v593_v14 }
 0x5eb   : > { %v654_v20 = vpop.xlane.xlu0 %653  ;;  %v650_v34 = vpop.xlane.xlu1 %649 }
 0x5ec   : > { %666 = vst.msk [vmem:[#allocation3 + $0x10] sm:$0xff] %vm659_vm7, %v654_v20  ;;  %665 = vst.msk [vmem:[#allocation3 + $0x8] sm:$0xff] %vm659_vm7, %v650_v34 }
 0x5ef   : > { %v711_v26 = vpop.xlane.xlu0 %710  ;;  %v658_v37 = vpop.xlane.xlu1 %657 }
 0x5f0   : > { %729 = vst.msk [vmem:[#allocation3] sm:$0xff] %vm724_vm12, %v711_v26 }
 0x5f1   : > { %667 = vst.msk [vmem:[#allocation3 + $0x18] sm:$0xff] %vm659_vm7, %v658_v37 }
 0x5f3   : > { %v719_v41 = vpop.xlane.xlu0 %718  ;;  %v715_v48 = vpop.xlane.xlu1 %714 }
 0x5f4   : > { %731 = vst.msk [vmem:[#allocation3 + $0x10] sm:$0xff] %vm724_vm12, %v719_v41  ;;  %730 = vst.msk [vmem:[#allocation3 + $0x8] sm:$0xff] %vm724_vm12, %v715_v48 }
 0x5f7   : > { %v776_v49 = vpop.xlane.xlu0 %775  ;;  %v723_v52 = vpop.xlane.xlu1 %722 }
 0x5f8   : > { %794 = vst.msk [vmem:[#allocation3] sm:$0xff] %vm789_vm4, %v776_v49 }
 0x5f9   : > { %732 = vst.msk [vmem:[#allocation3 + $0x18] sm:$0xff] %vm724_vm12, %v723_v52 }
 0x5fb   : > { %v784_v53 = vpop.xlane.xlu0 %783  ;;  %v780_v54 = vpop.xlane.xlu1 %779 }
 0x5fc   : > { %796 = vst.msk [vmem:[#allocation3 + $0x10] sm:$0xff] %vm789_vm4, %v784_v53  ;;  %795 = vst.msk [vmem:[#allocation3 + $0x8] sm:$0xff] %vm789_vm4, %v780_v54 }
 0x5ff   : > { %v841_v55 = vpop.xlane.xlu0 %840  ;;  %v788_v57 = vpop.xlane.xlu1 %787 }
 0x600   : > { %859 = vst.msk [vmem:[#allocation3] sm:$0xff] %vm854_vm10, %v841_v55 }
 0x601   : > { %797 = vst.msk [vmem:[#allocation3 + $0x18] sm:$0xff] %vm789_vm4, %v788_v57 }
 0x603   : > { %v849_v58 = vpop.xlane.xlu0 %848  ;;  %v845_v59 = vpop.xlane.xlu1 %844 }
 0x604   : > { %861 = vst.msk [vmem:[#allocation3 + $0x10] sm:$0xff] %vm854_vm10, %v849_v58  ;;  %860 = vst.msk [vmem:[#allocation3 + $0x8] sm:$0xff] %vm854_vm10, %v845_v59 }
 0x607   : > { %v906_v61 = vpop.xlane.xlu0 %905  ;;  %v853_v62 = vpop.xlane.xlu1 %852 }
 0x608   : > { %924 = vst.msk [vmem:[#allocation3] sm:$0xff] %vm919_vm3, %v906_v61 }
 0x609   : > { %862 = vst.msk [vmem:[#allocation3 + $0x18] sm:$0xff] %vm854_vm10, %v853_v62 }
 0x60b   : > { %v914_v0 = vpop.xlane.xlu0 %913  ;;  %v910_v1 = vpop.xlane.xlu1 %909 }
 0x60c   : > { %926 = vst.msk [vmem:[#allocation3 + $0x10] sm:$0xff] %vm919_vm3, %v914_v0  ;;  %925 = vst.msk [vmem:[#allocation3 + $0x8] sm:$0xff] %vm919_vm3, %v910_v1 }
 0x60f   : > { %v971_v3 = vpop.xlane.xlu0 %970  ;;  %v918_v5 = vpop.xlane.xlu1 %917 }
 0x610   : > { %989 = vst.msk [vmem:[#allocation3] sm:$0xff] %vm984_vm11, %v971_v3 }
 0x611   : > { %927 = vst.msk [vmem:[#allocation3 + $0x18] sm:$0xff] %vm919_vm3, %v918_v5 }
 0x613   : > { %v979_v8 = vpop.xlane.xlu0 %978  ;;  %v975_v12 = vpop.xlane.xlu1 %974 }
 0x614   : > { %991 = vst.msk [vmem:[#allocation3 + $0x10] sm:$0xff] %vm984_vm11, %v979_v8  ;;  %990 = vst.msk [vmem:[#allocation3 + $0x8] sm:$0xff] %vm984_vm11, %v975_v12 }
 0x617   : > { %v1036_v13 = vpop.xlane.xlu0 %1035  ;;  %v983_v15 = vpop.xlane.xlu1 %982 }
 0x618   : > { %1054 = vst.msk [vmem:[#allocation3] sm:$0xff] %vm1049_vm6, %v1036_v13 }
 0x619   : > { %992 = vst.msk [vmem:[#allocation3 + $0x18] sm:$0xff] %vm984_vm11, %v983_v15 }
 0x61b   : > { %v1044_v16 = vpop.xlane.xlu0 %1043  ;;  %v1040_v17 = vpop.xlane.xlu1 %1039 }
 0x61c   : > { %1056 = vst.msk [vmem:[#allocation3 + $0x10] sm:$0xff] %vm1049_vm6, %v1044_v16  ;;  %1055 = vst.msk [vmem:[#allocation3 + $0x8] sm:$0xff] %vm1049_vm6, %v1040_v17 }
 0x61f   : > { %v1048_v18 = vpop.xlane.xlu1 %1047 }
 0x620   : > { %1057 = vst.msk [vmem:[#allocation3 + $0x18] sm:$0xff] %vm1049_vm6, %v1048_v18 }
 0x664   : > { %v1101_v21 = vpop.xlane.xlu0 %1100 }
 0x665   : > { %1119 = vst.msk [vmem:[#allocation3] sm:$0xff] %vm1114_vm14, %v1101_v21 }
 0x668   : > { %v1109_v23 = vpop.xlane.xlu0 %1108  ;;  %v1105_v24 = vpop.xlane.xlu1 %1104 }
 0x669   : > { %1121 = vst.msk [vmem:[#allocation3 + $0x10] sm:$0xff] %vm1114_vm14, %v1109_v23  ;;  %1120 = vst.msk [vmem:[#allocation3 + $0x8] sm:$0xff] %vm1114_vm14, %v1105_v24 }
 0x66c   : > { %v1253_v6 = vld [vmem:[#allocation3] sm:$0xff] }
 0x66d   : > { %1257 = vmax.xlane.f32.xlu0 %v1253_v6 }
 0x66e   : > { %v1113_v27 = vpop.xlane.xlu1 %1112 }
 0x66f   : > { %1122 = vst.msk [vmem:[#allocation3 + $0x18] sm:$0xff] %vm1114_vm14, %v1113_v27 }
 0x670   : > { %v1255_v7 = vld [vmem:[#allocation3 + $0x10] sm:$0xff]  ;;  %v1254_v28 = vld [vmem:[#allocation3 + $0x8] sm:$0xff] }
 0x671   : > { %1261 = vmax.xlane.f32.xlu0 %v1255_v7  ;;  %1259 = vmax.xlane.f32.xlu1 %v1254_v28 }
 0x676   : > { %v1256_v10 = vld [vmem:[#allocation3 + $0x18] sm:$0xff] }
 0x677   : > { %1263 = vmax.xlane.f32.xlu1 %v1256_v10 }
 0x687   : > { %1231 = vrot.lane.b32.xlu0 %v1208_v30, %s1575_s17 }
 0x688   : > { %1233 = vrot.lane.b32.xlu1 %v1475_v29, %s1575_s17 }
 0x68c   : > { %1235 = vrot.lane.b32.xlu1 %v1218_v35, %s1575_s17 }
 0x690   : > { %1237 = vrot.lane.b32.xlu1 %v1478_v33, %s1575_s17 }
 0x6f6   : > { %v1258_v36 = vpop.xlane.xlu0 %1257 }
 0x6fa   : > { %v1262_v38 = vpop.xlane.xlu0 %1261  ;;  %v1260_v39 = vpop.xlane.xlu1 %1259 }
 0x6fe   : > { %v1232_v45 = vpop.permute.xlu0 %1231 }
 0x6ff   : > { %v1243_v40 = vsub.f32 %v1208_v30, %v1232_v45 }
 0x700   : > { %v1264_v31 = vpop.xlane.xlu1 %1263 }
 0x701   : > { %v1249_v43 = vadd.f32 %v1248_v44, %v1243_v40 }
 0x703   : > { %v1265_v51 = vadd.f32 %v1258_v36, %v1249_v43 }
 0x704   : > { %v1234_v46 = vpop.permute.xlu1 %1233 }
 0x705   : > { %v1244_v60 = vsub.f32 %v1475_v29, %v1234_v46  ;;  %v1269_v63 = vmax.f32 %v1265_v51, 0.0 }
 0x707   : > { %v1250_v2 = vadd.f32 %v1248_v44, %v1244_v60  ;;  %1505 = vtanh.f32 %v1269_v63 }
 0x708   : > { %v1236_v9 = vpop.permute.xlu1 %1235 }
 0x709   : > { %v1266_v19 = vadd.f32 %v1260_v39, %v1250_v2  ;;  %v1245_v22 = vsub.f32 %v1218_v35, %v1236_v9 }
 0x70b   : > { %v1270_v25 = vmax.f32 %v1266_v19, 0.0  ;;  %v1251_v32 = vadd.f32 %v1248_v44, %v1245_v22 }
 0x70c   : > { %v1238_v42 = vpop.permute.xlu1 %1237 }
 0x70d   : > { %1507 = vtanh.f32 %v1270_v25  ;;  %v1267_v47 = vadd.f32 %v1262_v38, %v1251_v32  ;;  %v1246_v50 = vsub.f32 %v1478_v33, %v1238_v42 }
 0x70f   : > { %v1271_v56 = vmax.f32 %v1267_v47, 0.0  ;;  %v1252_v4 = vadd.f32 %v1248_v44, %v1246_v50 }
 0x711   : > { %1509 = vtanh.f32 %v1271_v56  ;;  %v1268_v11 = vadd.f32 %v1264_v31, %v1252_v4 }
 0x713   : > { %v1272_v14 = vmax.f32 %v1268_v11, 0.0 }
 0x714   : > { %v1506_v20 = vpop.eup %1505 }
 0x715   : > { %1511 = vtanh.f32 %v1272_v14  ;;  %1277 = vst.msk [vmem:[%s383_s21] sm:$0xff] %vm594_vm2, %v1506_v20 }
 0x71a   : > { %v1508_v34 = vpop.eup %1507 }
 0x71b   : > { %1278 = vst.msk [vmem:[%s383_s21 + $0x8] sm:$0xff] %vm594_vm2, %v1508_v34 }
 0x71e   : > { %v1510_v26 = vpop.eup %1509 }
 0x71f   : > { %1279 = vst.msk [vmem:[%s383_s21 + $0x10] sm:$0xff] %vm594_vm2, %v1510_v26 }
 0x722   : > { %v1512_v37 = vpop.eup %1511 }
 0x723   : > { %1280 = vst.msk [vmem:[%s383_s21 + $0x18] sm:$0xff] %vm594_vm2, %v1512_v37 }
 0x724 PF: > { %s17_s25 = sadd.s32 1, %s1572_s25   ;;  %s1940_s23 = smov %s1568_s24 }
 0x725   : > { %p14_p5 = scmp.ge.s32.totalorder %s17_s25, 4   ;;  %s1941_s24 = smov %s1943_s5 }
 0x727   :  { %16 = sbr.rel (!%p14_p5) target bundleno = 2 (0x2), region = 91 }

</bundles_post_ra>
